<compile_context>
chip_gen: v7x
topology: tpu7x:2x2x1
jax: 0.10.0
libtpu: 0.0.40
codegen_flags: <defaults>
</compile_context>

<pallas_src>
import jax
import jax.numpy as jnp
from jax.experimental import pallas as pl
from jax.experimental.pallas import tpu as pltpu


def encoder_kernel(ids_ref, emb_ref, w_ref, b_ref,      # inputs (VMEM resident)
                   out_ref, hn_ref, cn_ref):            # outputs (VMEM resident)
    S, B, H = out_ref.shape
    L = hn_ref.shape[0]
    V, E = emb_ref.shape

    # ---- Embedding for ALL timesteps: one-hot @ table on the MXU. ----------
    ids = ids_ref[...]                                          # (S*B, 1) int32
    col = jax.lax.broadcasted_iota(jnp.int32, (S * B, V), 1)    # (S*B, V)
    onehot = jnp.where(ids == col, 1.0, 0.0).astype(jnp.float32)
    x_all = jnp.dot(onehot, emb_ref[...],
                    preferred_element_type=jnp.float32)         # (S*B, E)
    # (dropout on the embedded sequence: identity in eval mode)

    # ---- Hoist weight / bias loads out of the unrolled time loop. ----------
    w = [w_ref[l] for l in range(L)]                            # each (E+H, 4H)
    b = [b_ref[l] for l in range(L)]                            # each (1, 4H)

    # Layer-0 input projection for all timesteps (non-recurrent part).
    x0_gates = jnp.dot(x_all, w[0][:E, :],
                       preferred_element_type=jnp.float32)      # (S*B, 4H)

    # ---- Zero-init state; hn/cn refs hold the running (h, c) per layer. ----
    hn_ref[...] = jnp.zeros_like(hn_ref)
    cn_ref[...] = jnp.zeros_like(cn_ref)

    def lstm_cell(gates, c_prev):
        # Gate columns pre-permuted to (i, f, o, g): sigmoid on one contiguous
        # 3H slice, tanh on the last H (transcendentals run on the EUP).
        sig = jax.nn.sigmoid(gates[:, :3 * H])
        g_g = jnp.tanh(gates[:, 3 * H:])
        i_g = sig[:, 0 * H:1 * H]
        f_g = sig[:, 1 * H:2 * H]
        o_g = sig[:, 2 * H:3 * H]
        c_new = f_g * c_prev + i_g * g_g
        h_new = o_g * jnp.tanh(c_new)
        return h_new, c_new

    # ---- Fully unrolled recurrence (S is small and static). ----------------
    for t in range(S):
        # Layer 0: precomputed input projection + recurrent projection.
        h_prev, c_prev = hn_ref[0], cn_ref[0]
        gates = (x0_gates[t * B:(t + 1) * B, :]
                 + jnp.dot(h_prev, w[0][E:, :],
                           preferred_element_type=jnp.float32)
                 + b[0])
        h_new, c_new = lstm_cell(gates, c_prev)
        hn_ref[0] = h_new
        cn_ref[0] = c_new
        x = h_new

        # Layers 1..L-1: fused [x, h] @ [W_ih; W_hh] matmul.
        for l in range(1, L):
            h_prev, c_prev = hn_ref[l], cn_ref[l]
            xh = jnp.concatenate([x, h_prev], axis=1)           # (B, 2H)
            gates = jnp.dot(xh, w[l],
                            preferred_element_type=jnp.float32) + b[l]
            h_new, c_new = lstm_cell(gates, c_prev)
            hn_ref[l] = h_new
            cn_ref[l] = c_new
            x = h_new          # inter-layer dropout: identity in eval mode

        out_ref[t] = x                                          # top-layer h_t


def encoder_forward(input_seq, emb_table, w_ih, w_hh, b_ih, b_hh):
    """input_seq: (B, S) int32 token ids.
    emb_table: (V, E) f32.
    w_ih: (L, 4H, E), w_hh: (L, 4H, H), b_ih/b_hh: (L, 4H)  (PyTorch layouts;
    requires E == H so the fused per-layer weights stack uniformly)."""
    B, S = input_seq.shape
    V, E = emb_table.shape
    L, fourH, H = w_hh.shape
    assert E == H, "stacked fused weights require embedding_dim == hidden_dim"

    def reorder_gates(x):
        # PyTorch gate blocks (i, f, g, o) along the last axis -> (i, f, o, g)
        i, f, g, o = jnp.split(x, 4, axis=-1)
        return jnp.concatenate([i, f, o, g], axis=-1)

    # Fused per-layer weights: [W_ih; W_hh]^T -> (E+H, 4H), gate-reordered.
    w_ih_t = jnp.transpose(w_ih, (0, 2, 1))                       # (L, E, 4H)
    w_hh_t = jnp.transpose(w_hh, (0, 2, 1))                       # (L, H, 4H)
    w_cat = reorder_gates(jnp.concatenate([w_ih_t, w_hh_t], axis=1)
                          ).astype(jnp.float32)                   # (L, E+H, 4H)
    bias = reorder_gates(b_ih + b_hh).reshape(L, 1, fourH).astype(jnp.float32)

    # Time-major flat ids, shaped (S*B, 1) for the in-kernel one-hot compare.
    ids = jnp.transpose(input_seq).reshape(S * B, 1).astype(jnp.int32)

    vmem = pl.BlockSpec(memory_space=pltpu.MemorySpace.VMEM)
    out_sbh, h_n, c_n = pl.pallas_call(
        encoder_kernel,
        out_shape=(
            jax.ShapeDtypeStruct((S, B, H), jnp.float32),   # per-step top-layer h
            jax.ShapeDtypeStruct((L, B, H), jnp.float32),   # h_n
            jax.ShapeDtypeStruct((L, B, H), jnp.float32),   # c_n
        ),
        in_specs=[vmem, vmem, vmem, vmem],
        out_specs=(vmem, vmem, vmem),
    )(ids, emb_table.astype(jnp.float32), w_cat, bias)

    output = jnp.transpose(out_sbh, (1, 0, 2))              # (B, S, H) batch_first
    return output, (h_n, c_n)


def encoder_reference(input_seq, emb_table, w_ih, w_hh, b_ih, b_hh):
    """Pure-JAX reference of Embedding + stacked LSTM (eval mode)."""
    B, S = input_seq.shape
    L, fourH, H = w_hh.shape
    layer_in = jnp.take(emb_table, input_seq, axis=0)             # (B, S, E)
    h_fin, c_fin = [], []
    for l in range(L):
        h = jnp.zeros((B, H), jnp.float32)
        c = jnp.zeros((B, H), jnp.float32)
        outs = []
        for t in range(S):
            x_t = layer_in[:, t, :]
            gates = x_t @ w_ih[l].T + h @ w_hh[l].T + b_ih[l] + b_hh[l]
            i_g = jax.nn.sigmoid(gates[:, 0 * H:1 * H])
            f_g = jax.nn.sigmoid(gates[:, 1 * H:2 * H])
            g_g = jnp.tanh(gates[:, 2 * H:3 * H])
            o_g = jax.nn.sigmoid(gates[:, 3 * H:4 * H])
            c = f_g * c + i_g * g_g
            h = o_g * jnp.tanh(c)
            outs.append(h)
        layer_in = jnp.stack(outs, axis=1)                        # (B, S, H)
        h_fin.append(h)
        c_fin.append(c)
    return layer_in, (jnp.stack(h_fin), jnp.stack(c_fin))


if __name__ == "__main__":
    # Small shapes consistent with the module: vocab 16, embed=hidden=32,
    # 2 layers, batch 2, sequence 8.
    B, S, V, E, H, L = 2, 8, 16, 32, 32, 2

    key = jax.random.PRNGKey(0)
    k1, k2, k3, k4, k5, k6 = jax.random.split(key, 6)

    input_seq = jax.random.randint(k1, (B, S), 0, V, dtype=jnp.int32)
    emb_table = jax.random.normal(k2, (V, E), dtype=jnp.float32) * 0.5
    w_ih = jax.random.normal(k3, (L, 4 * H, E), dtype=jnp.float32) * 0.1
    w_hh = jax.random.normal(k4, (L, 4 * H, H), dtype=jnp.float32) * 0.1
    b_ih = jax.random.normal(k5, (L, 4 * H), dtype=jnp.float32) * 0.1
    b_hh = jax.random.normal(k6, (L, 4 * H), dtype=jnp.float32) * 0.1

    output, (h_n, c_n) = encoder_forward(input_seq, emb_table,
                                         w_ih, w_hh, b_ih, b_hh)
    output = jax.block_until_ready(output)
    h_n = jax.block_until_ready(h_n)
    c_n = jax.block_until_ready(c_n)

    ref_out, (ref_h, ref_c) = encoder_reference(input_seq, emb_table,
                                                w_ih, w_hh, b_ih, b_hh)

    assert output.shape == (B, S, H)
    assert h_n.shape == (L, B, H) and c_n.shape == (L, B, H)
    assert jnp.allclose(output, ref_out, atol=2e-3, rtol=2e-3)
    assert jnp.allclose(h_n, ref_h, atol=2e-3, rtol=2e-3)
    assert jnp.allclose(c_n, ref_c, atol=2e-3, rtol=2e-3)

    print("KERNEL_OK")
</pallas_src>

<mosaic_0001>
module attributes {stable_mosaic.version = 11 : i64} {
  func.func @encoder_kernel(%arg0: memref<16x1xi32, #tpu.memory_space<vmem>>, %arg1: memref<16x32xf32, #tpu.memory_space<vmem>>, %arg2: memref<2x64x128xf32, #tpu.memory_space<vmem>>, %arg3: memref<2x1x128xf32, #tpu.memory_space<vmem>>, %arg4: memref<8x2x32xf32, #tpu.memory_space<vmem>>, %arg5: memref<2x2x32xf32, #tpu.memory_space<vmem>>, %arg6: memref<2x2x32xf32, #tpu.memory_space<vmem>>) attributes {dimension_semantics = [], scalar_prefetch = 0 : i64, scratch_operands = 0 : i64, tpu.core_type = #tpu.core_type<tc>} {
    %c0 = arith.constant 0 : index
    %c0_0 = arith.constant 0 : index
    %0 = vector.load %arg0[%c0, %c0_0] : memref<16x1xi32, #tpu.memory_space<vmem>>, vector<16x1xi32>
    %1 = tpu.iota {dimensions = array<i32: 1>} : vector<16x16xi32>
    %2 = vector.broadcast %0 : vector<16x1xi32> to vector<16x16xi32>
    %3 = arith.cmpi eq, %2, %1 : vector<16x16xi32>
    %cst = arith.constant 1.000000e+00 : f32
    %cst_1 = arith.constant 0.000000e+00 : f32
    %4 = vector.broadcast %cst : f32 to vector<16x16xf32>
    %5 = vector.broadcast %cst_1 : f32 to vector<16x16xf32>
    %6 = arith.select %3, %4, %5 : vector<16x16xi1>, vector<16x16xf32>
    %c0_2 = arith.constant 0 : index
    %c0_3 = arith.constant 0 : index
    %7 = vector.load %arg1[%c0_2, %c0_3] : memref<16x32xf32, #tpu.memory_space<vmem>>, vector<16x32xf32>
    %cst_4 = arith.constant dense<0.000000e+00> : vector<16x32xf32>
    %8 = tpu.matmul %6, %7, %cst_4 {dimension_numbers = #tpu.dot_dimension_numbers<[1], [0], [0], [1], [0, 0, 1, 1], [], []>} : vector<16x16xf32>, vector<16x32xf32>, vector<16x32xf32> -> vector<16x32xf32>
    %c0_5 = arith.constant 0 : index
    %c0_6 = arith.constant 0 : index
    %c0_7 = arith.constant 0 : index
    %9 = vector.load %arg2[%c0_5, %c0_6, %c0_7] : memref<2x64x128xf32, #tpu.memory_space<vmem>>, vector<1x64x128xf32>
    %10 = vector.shape_cast %9 : vector<1x64x128xf32> to vector<64x128xf32>
    %c1 = arith.constant 1 : index
    %c0_8 = arith.constant 0 : index
    %c0_9 = arith.constant 0 : index
    %11 = vector.load %arg2[%c1, %c0_8, %c0_9] : memref<2x64x128xf32, #tpu.memory_space<vmem>>, vector<1x64x128xf32>
    %12 = vector.shape_cast %11 : vector<1x64x128xf32> to vector<64x128xf32>
    %c0_10 = arith.constant 0 : index
    %c0_11 = arith.constant 0 : index
    %c0_12 = arith.constant 0 : index
    %13 = vector.load %arg3[%c0_10, %c0_11, %c0_12] : memref<2x1x128xf32, #tpu.memory_space<vmem>>, vector<1x1x128xf32>
    %14 = vector.shape_cast %13 : vector<1x1x128xf32> to vector<1x128xf32>
    %c1_13 = arith.constant 1 : index
    %c0_14 = arith.constant 0 : index
    %c0_15 = arith.constant 0 : index
    %15 = vector.load %arg3[%c1_13, %c0_14, %c0_15] : memref<2x1x128xf32, #tpu.memory_space<vmem>>, vector<1x1x128xf32>
    %16 = vector.shape_cast %15 : vector<1x1x128xf32> to vector<1x128xf32>
    %17 = vector.extract_strided_slice %10 {offsets = [0, 0], sizes = [32, 128], strides = [1, 1]} : vector<64x128xf32> to vector<32x128xf32>
    %cst_16 = arith.constant dense<0.000000e+00> : vector<16x128xf32>
    %18 = tpu.matmul %8, %17, %cst_16 {dimension_numbers = #tpu.dot_dimension_numbers<[1], [0], [0], [1], [0, 0, 1, 1], [], []>} : vector<16x32xf32>, vector<32x128xf32>, vector<16x128xf32> -> vector<16x128xf32>
    %cst_17 = arith.constant 0.000000e+00 : f32
    %19 = vector.broadcast %cst_17 : f32 to vector<2x2x32xf32>
    %c0_18 = arith.constant 0 : index
    %c0_19 = arith.constant 0 : index
    %c0_20 = arith.constant 0 : index
    %20 = vector.load %arg5[%c0_18, %c0_19, %c0_20] : memref<2x2x32xf32, #tpu.memory_space<vmem>>, vector<2x2x32xf32>
    tpu.vector_store %arg5[%c0_18, %c0_19, %c0_20], %19 {strides = array<i32>} : memref<2x2x32xf32, #tpu.memory_space<vmem>>, vector<2x2x32xf32>,
    %cst_21 = arith.constant 0.000000e+00 : f32
    %21 = vector.broadcast %cst_21 : f32 to vector<2x2x32xf32>
    %c0_22 = arith.constant 0 : index
    %c0_23 = arith.constant 0 : index
    %c0_24 = arith.constant 0 : index
    %22 = vector.load %arg6[%c0_22, %c0_23, %c0_24] : memref<2x2x32xf32, #tpu.memory_space<vmem>>, vector<2x2x32xf32>
    tpu.vector_store %arg6[%c0_22, %c0_23, %c0_24], %21 {strides = array<i32>} : memref<2x2x32xf32, #tpu.memory_space<vmem>>, vector<2x2x32xf32>,
    %c0_25 = arith.constant 0 : index
    %c0_26 = arith.constant 0 : index
    %c0_27 = arith.constant 0 : index
    %23 = vector.load %arg5[%c0_25, %c0_26, %c0_27] : memref<2x2x32xf32, #tpu.memory_space<vmem>>, vector<1x2x32xf32>
    %24 = vector.shape_cast %23 : vector<1x2x32xf32> to vector<2x32xf32>
    %c0_28 = arith.constant 0 : index
    %c0_29 = arith.constant 0 : index
    %c0_30 = arith.constant 0 : index
    %25 = vector.load %arg6[%c0_28, %c0_29, %c0_30] : memref<2x2x32xf32, #tpu.memory_space<vmem>>, vector<1x2x32xf32>
    %26 = vector.shape_cast %25 : vector<1x2x32xf32> to vector<2x32xf32>
    %27 = vector.extract_strided_slice %18 {offsets = [0, 0], sizes = [2, 128], strides = [1, 1]} : vector<16x128xf32> to vector<2x128xf32>
    %28 = vector.extract_strided_slice %10 {offsets = [32, 0], sizes = [32, 128], strides = [1, 1]} : vector<64x128xf32> to vector<32x128xf32>
    %cst_31 = arith.constant dense<0.000000e+00> : vector<2x128xf32>
    %29 = tpu.matmul %24, %28, %cst_31 {dimension_numbers = #tpu.dot_dimension_numbers<[1], [0], [0], [1], [0, 0, 1, 1], [], []>} : vector<2x32xf32>, vector<32x128xf32>, vector<2x128xf32> -> vector<2x128xf32>
    %30 = arith.addf %27, %29 : vector<2x128xf32>
    %31 = vector.broadcast %14 : vector<1x128xf32> to vector<2x128xf32>
    %32 = arith.addf %30, %31 : vector<2x128xf32>
    %33 = vector.extract_strided_slice %32 {offsets = [0, 0], sizes = [2, 96], strides = [1, 1]} : vector<2x128xf32> to vector<2x96xf32>
    %34 = arith.negf %33 : vector<2x96xf32>
    %35 = math.exp %34 : vector<2x96xf32>
    %cst_32 = arith.constant 1.000000e+00 : f32
    %36 = vector.broadcast %cst_32 : f32 to vector<2x96xf32>
    %37 = arith.addf %36, %35 : vector<2x96xf32>
    %38 = arith.divf %36, %37 : vector<2x96xf32>
    %39 = vector.extract_strided_slice %32 {offsets = [0, 96], sizes = [2, 32], strides = [1, 1]} : vector<2x128xf32> to vector<2x32xf32>
    %40 = math.tanh %39 : vector<2x32xf32>
    %41 = vector.extract_strided_slice %38 {offsets = [0, 0], sizes = [2, 32], strides = [1, 1]} : vector<2x96xf32> to vector<2x32xf32>
    %42 = vector.extract_strided_slice %38 {offsets = [0, 32], sizes = [2, 32], strides = [1, 1]} : vector<2x96xf32> to vector<2x32xf32>
    %43 = vector.extract_strided_slice %38 {offsets = [0, 64], sizes = [2, 32], strides = [1, 1]} : vector<2x96xf32> to vector<2x32xf32>
    %44 = arith.mulf %42, %26 : vector<2x32xf32>
    %45 = arith.mulf %41, %40 : vector<2x32xf32>
    %46 = arith.addf %44, %45 : vector<2x32xf32>
    %47 = math.tanh %46 : vector<2x32xf32>
    %48 = arith.mulf %43, %47 : vector<2x32xf32>
    %c0_33 = arith.constant 0 : index
    %c0_34 = arith.constant 0 : index
    %c0_35 = arith.constant 0 : index
    %49 = vector.load %arg5[%c0_33, %c0_34, %c0_35] : memref<2x2x32xf32, #tpu.memory_space<vmem>>, vector<1x2x32xf32>
    %50 = vector.shape_cast %49 : vector<1x2x32xf32> to vector<2x32xf32>
    %51 = vector.shape_cast %48 : vector<2x32xf32> to vector<1x2x32xf32>
    tpu.vector_store %arg5[%c0_33, %c0_34, %c0_35], %51 {strides = array<i32>} : memref<2x2x32xf32, #tpu.memory_space<vmem>>, vector<1x2x32xf32>,
    %c0_36 = arith.constant 0 : index
    %c0_37 = arith.constant 0 : index
    %c0_38 = arith.constant 0 : index
    %52 = vector.load %arg6[%c0_36, %c0_37, %c0_38] : memref<2x2x32xf32, #tpu.memory_space<vmem>>, vector<1x2x32xf32>
    %53 = vector.shape_cast %52 : vector<1x2x32xf32> to vector<2x32xf32>
    %54 = vector.shape_cast %46 : vector<2x32xf32> to vector<1x2x32xf32>
    tpu.vector_store %arg6[%c0_36, %c0_37, %c0_38], %54 {strides = array<i32>} : memref<2x2x32xf32, #tpu.memory_space<vmem>>, vector<1x2x32xf32>,
    %c1_39 = arith.constant 1 : index
    %c0_40 = arith.constant 0 : index
    %c0_41 = arith.constant 0 : index
    %55 = vector.load %arg5[%c1_39, %c0_40, %c0_41] : memref<2x2x32xf32, #tpu.memory_space<vmem>>, vector<1x2x32xf32>
    %56 = vector.shape_cast %55 : vector<1x2x32xf32> to vector<2x32xf32>
    %c1_42 = arith.constant 1 : index
    %c0_43 = arith.constant 0 : index
    %c0_44 = arith.constant 0 : index
    %57 = vector.load %arg6[%c1_42, %c0_43, %c0_44] : memref<2x2x32xf32, #tpu.memory_space<vmem>>, vector<1x2x32xf32>
    %58 = vector.shape_cast %57 : vector<1x2x32xf32> to vector<2x32xf32>
    %59 = tpu.concatenate %48, %56 in 1 : vector<2x32xf32>, vector<2x32xf32> -> vector<2x64xf32>
    %cst_45 = arith.constant dense<0.000000e+00> : vector<2x128xf32>
    %60 = tpu.matmul %59, %12, %cst_45 {dimension_numbers = #tpu.dot_dimension_numbers<[1], [0], [0], [1], [0, 0, 1, 1], [], []>} : vector<2x64xf32>, vector<64x128xf32>, vector<2x128xf32> -> vector<2x128xf32>
    %61 = vector.broadcast %16 : vector<1x128xf32> to vector<2x128xf32>
    %62 = arith.addf %60, %61 : vector<2x128xf32>
    %63 = vector.extract_strided_slice %62 {offsets = [0, 0], sizes = [2, 96], strides = [1, 1]} : vector<2x128xf32> to vector<2x96xf32>
    %64 = arith.negf %63 : vector<2x96xf32>
    %65 = math.exp %64 : vector<2x96xf32>
    %cst_46 = arith.constant 1.000000e+00 : f32
    %66 = vector.broadcast %cst_46 : f32 to vector<2x96xf32>
    %67 = arith.addf %66, %65 : vector<2x96xf32>
    %68 = arith.divf %66, %67 : vector<2x96xf32>
    %69 = vector.extract_strided_slice %62 {offsets = [0, 96], sizes = [2, 32], strides = [1, 1]} : vector<2x128xf32> to vector<2x32xf32>
    %70 = math.tanh %69 : vector<2x32xf32>
    %71 = vector.extract_strided_slice %68 {offsets = [0, 0], sizes = [2, 32], strides = [1, 1]} : vector<2x96xf32> to vector<2x32xf32>
    %72 = vector.extract_strided_slice %68 {offsets = [0, 32], sizes = [2, 32], strides = [1, 1]} : vector<2x96xf32> to vector<2x32xf32>
    %73 = vector.extract_strided_slice %68 {offsets = [0, 64], sizes = [2, 32], strides = [1, 1]} : vector<2x96xf32> to vector<2x32xf32>
    %74 = arith.mulf %72, %58 : vector<2x32xf32>
    %75 = arith.mulf %71, %70 : vector<2x32xf32>
    %76 = arith.addf %74, %75 : vector<2x32xf32>
    %77 = math.tanh %76 : vector<2x32xf32>
    %78 = arith.mulf %73, %77 : vector<2x32xf32>
    %c1_47 = arith.constant 1 : index
    %c0_48 = arith.constant 0 : index
    %c0_49 = arith.constant 0 : index
    %79 = vector.load %arg5[%c1_47, %c0_48, %c0_49] : memref<2x2x32xf32, #tpu.memory_space<vmem>>, vector<1x2x32xf32>
    %80 = vector.shape_cast %79 : vector<1x2x32xf32> to vector<2x32xf32>
    %81 = vector.shape_cast %78 : vector<2x32xf32> to vector<1x2x32xf32>
    tpu.vector_store %arg5[%c1_47, %c0_48, %c0_49], %81 {strides = array<i32>} : memref<2x2x32xf32, #tpu.memory_space<vmem>>, vector<1x2x32xf32>,
    %c1_50 = arith.constant 1 : index
    %c0_51 = arith.constant 0 : index
    %c0_52 = arith.constant 0 : index
    %82 = vector.load %arg6[%c1_50, %c0_51, %c0_52] : memref<2x2x32xf32, #tpu.memory_space<vmem>>, vector<1x2x32xf32>
    %83 = vector.shape_cast %82 : vector<1x2x32xf32> to vector<2x32xf32>
    %84 = vector.shape_cast %76 : vector<2x32xf32> to vector<1x2x32xf32>
    tpu.vector_store %arg6[%c1_50, %c0_51, %c0_52], %84 {strides = array<i32>} : memref<2x2x32xf32, #tpu.memory_space<vmem>>, vector<1x2x32xf32>,
    %c0_53 = arith.constant 0 : index
    %c0_54 = arith.constant 0 : index
    %c0_55 = arith.constant 0 : index
    %85 = vector.load %arg4[%c0_53, %c0_54, %c0_55] : memref<8x2x32xf32, #tpu.memory_space<vmem>>, vector<1x2x32xf32>
    %86 = vector.shape_cast %85 : vector<1x2x32xf32> to vector<2x32xf32>
    %87 = vector.shape_cast %78 : vector<2x32xf32> to vector<1x2x32xf32>
    tpu.vector_store %arg4[%c0_53, %c0_54, %c0_55], %87 {strides = array<i32>} : memref<8x2x32xf32, #tpu.memory_space<vmem>>, vector<1x2x32xf32>,
    %c0_56 = arith.constant 0 : index
    %c0_57 = arith.constant 0 : index
    %c0_58 = arith.constant 0 : index
    %88 = vector.load %arg5[%c0_56, %c0_57, %c0_58] : memref<2x2x32xf32, #tpu.memory_space<vmem>>, vector<1x2x32xf32>
    %89 = vector.shape_cast %88 : vector<1x2x32xf32> to vector<2x32xf32>
    %c0_59 = arith.constant 0 : index
    %c0_60 = arith.constant 0 : index
    %c0_61 = arith.constant 0 : index
    %90 = vector.load %arg6[%c0_59, %c0_60, %c0_61] : memref<2x2x32xf32, #tpu.memory_space<vmem>>, vector<1x2x32xf32>
    %91 = vector.shape_cast %90 : vector<1x2x32xf32> to vector<2x32xf32>
    %92 = vector.extract_strided_slice %18 {offsets = [2, 0], sizes = [2, 128], strides = [1, 1]} : vector<16x128xf32> to vector<2x128xf32>
    %93 = vector.extract_strided_slice %10 {offsets = [32, 0], sizes = [32, 128], strides = [1, 1]} : vector<64x128xf32> to vector<32x128xf32>
    %cst_62 = arith.constant dense<0.000000e+00> : vector<2x128xf32>
    %94 = tpu.matmul %89, %93, %cst_62 {dimension_numbers = #tpu.dot_dimension_numbers<[1], [0], [0], [1], [0, 0, 1, 1], [], []>} : vector<2x32xf32>, vector<32x128xf32>, vector<2x128xf32> -> vector<2x128xf32>
    %95 = arith.addf %92, %94 : vector<2x128xf32>
    %96 = vector.broadcast %14 : vector<1x128xf32> to vector<2x128xf32>
    %97 = arith.addf %95, %96 : vector<2x128xf32>
    %98 = vector.extract_strided_slice %97 {offsets = [0, 0], sizes = [2, 96], strides = [1, 1]} : vector<2x128xf32> to vector<2x96xf32>
    %99 = arith.negf %98 : vector<2x96xf32>
    %100 = math.exp %99 : vector<2x96xf32>
    %cst_63 = arith.constant 1.000000e+00 : f32
    %101 = vector.broadcast %cst_63 : f32 to vector<2x96xf32>
    %102 = arith.addf %101, %100 : vector<2x96xf32>
    %103 = arith.divf %101, %102 : vector<2x96xf32>
    %104 = vector.extract_strided_slice %97 {offsets = [0, 96], sizes = [2, 32], strides = [1, 1]} : vector<2x128xf32> to vector<2x32xf32>
    %105 = math.tanh %104 : vector<2x32xf32>
    %106 = vector.extract_strided_slice %103 {offsets = [0, 0], sizes = [2, 32], strides = [1, 1]} : vector<2x96xf32> to vector<2x32xf32>
    %107 = vector.extract_strided_slice %103 {offsets = [0, 32], sizes = [2, 32], strides = [1, 1]} : vector<2x96xf32> to vector<2x32xf32>
    %108 = vector.extract_strided_slice %103 {offsets = [0, 64], sizes = [2, 32], strides = [1, 1]} : vector<2x96xf32> to vector<2x32xf32>
    %109 = arith.mulf %107, %91 : vector<2x32xf32>
    %110 = arith.mulf %106, %105 : vector<2x32xf32>
    %111 = arith.addf %109, %110 : vector<2x32xf32>
    %112 = math.tanh %111 : vector<2x32xf32>
    %113 = arith.mulf %108, %112 : vector<2x32xf32>
    %c0_64 = arith.constant 0 : index
    %c0_65 = arith.constant 0 : index
    %c0_66 = arith.constant 0 : index
    %114 = vector.load %arg5[%c0_64, %c0_65, %c0_66] : memref<2x2x32xf32, #tpu.memory_space<vmem>>, vector<1x2x32xf32>
    %115 = vector.shape_cast %114 : vector<1x2x32xf32> to vector<2x32xf32>
    %116 = vector.shape_cast %113 : vector<2x32xf32> to vector<1x2x32xf32>
    tpu.vector_store %arg5[%c0_64, %c0_65, %c0_66], %116 {strides = array<i32>} : memref<2x2x32xf32, #tpu.memory_space<vmem>>, vector<1x2x32xf32>,
    %c0_67 = arith.constant 0 : index
    %c0_68 = arith.constant 0 : index
    %c0_69 = arith.constant 0 : index
    %117 = vector.load %arg6[%c0_67, %c0_68, %c0_69] : memref<2x2x32xf32, #tpu.memory_space<vmem>>, vector<1x2x32xf32>
    %118 = vector.shape_cast %117 : vector<1x2x32xf32> to vector<2x32xf32>
    %119 = vector.shape_cast %111 : vector<2x32xf32> to vector<1x2x32xf32>
    tpu.vector_store %arg6[%c0_67, %c0_68, %c0_69], %119 {strides = array<i32>} : memref<2x2x32xf32, #tpu.memory_space<vmem>>, vector<1x2x32xf32>,
    %c1_70 = arith.constant 1 : index
    %c0_71 = arith.constant 0 : index
    %c0_72 = arith.constant 0 : index
    %120 = vector.load %arg5[%c1_70, %c0_71, %c0_72] : memref<2x2x32xf32, #tpu.memory_space<vmem>>, vector<1x2x32xf32>
    %121 = vector.shape_cast %120 : vector<1x2x32xf32> to vector<2x32xf32>
    %c1_73 = arith.constant 1 : index
    %c0_74 = arith.constant 0 : index
    %c0_75 = arith.constant 0 : index
    %122 = vector.load %arg6[%c1_73, %c0_74, %c0_75] : memref<2x2x32xf32, #tpu.memory_space<vmem>>, vector<1x2x32xf32>
    %123 = vector.shape_cast %122 : vector<1x2x32xf32> to vector<2x32xf32>
    %124 = tpu.concatenate %113, %121 in 1 : vector<2x32xf32>, vector<2x32xf32> -> vector<2x64xf32>
    %cst_76 = arith.constant dense<0.000000e+00> : vector<2x128xf32>
    %125 = tpu.matmul %124, %12, %cst_76 {dimension_numbers = #tpu.dot_dimension_numbers<[1], [0], [0], [1], [0, 0, 1, 1], [], []>} : vector<2x64xf32>, vector<64x128xf32>, vector<2x128xf32> -> vector<2x128xf32>
    %126 = vector.broadcast %16 : vector<1x128xf32> to vector<2x128xf32>
    %127 = arith.addf %125, %126 : vector<2x128xf32>
    %128 = vector.extract_strided_slice %127 {offsets = [0, 0], sizes = [2, 96], strides = [1, 1]} : vector<2x128xf32> to vector<2x96xf32>
    %129 = arith.negf %128 : vector<2x96xf32>
    %130 = math.exp %129 : vector<2x96xf32>
    %cst_77 = arith.constant 1.000000e+00 : f32
    %131 = vector.broadcast %cst_77 : f32 to vector<2x96xf32>
    %132 = arith.addf %131, %130 : vector<2x96xf32>
    %133 = arith.divf %131, %132 : vector<2x96xf32>
    %134 = vector.extract_strided_slice %127 {offsets = [0, 96], sizes = [2, 32], strides = [1, 1]} : vector<2x128xf32> to vector<2x32xf32>
    %135 = math.tanh %134 : vector<2x32xf32>
    %136 = vector.extract_strided_slice %133 {offsets = [0, 0], sizes = [2, 32], strides = [1, 1]} : vector<2x96xf32> to vector<2x32xf32>
    %137 = vector.extract_strided_slice %133 {offsets = [0, 32], sizes = [2, 32], strides = [1, 1]} : vector<2x96xf32> to vector<2x32xf32>
    %138 = vector.extract_strided_slice %133 {offsets = [0, 64], sizes = [2, 32], strides = [1, 1]} : vector<2x96xf32> to vector<2x32xf32>
    %139 = arith.mulf %137, %123 : vector<2x32xf32>
    %140 = arith.mulf %136, %135 : vector<2x32xf32>
    %141 = arith.addf %139, %140 : vector<2x32xf32>
    %142 = math.tanh %141 : vector<2x32xf32>
    %143 = arith.mulf %138, %142 : vector<2x32xf32>
    %c1_78 = arith.constant 1 : index
    %c0_79 = arith.constant 0 : index
    %c0_80 = arith.constant 0 : index
    %144 = vector.load %arg5[%c1_78, %c0_79, %c0_80] : memref<2x2x32xf32, #tpu.memory_space<vmem>>, vector<1x2x32xf32>
    %145 = vector.shape_cast %144 : vector<1x2x32xf32> to vector<2x32xf32>
    %146 = vector.shape_cast %143 : vector<2x32xf32> to vector<1x2x32xf32>
    tpu.vector_store %arg5[%c1_78, %c0_79, %c0_80], %146 {strides = array<i32>} : memref<2x2x32xf32, #tpu.memory_space<vmem>>, vector<1x2x32xf32>,
    %c1_81 = arith.constant 1 : index
    %c0_82 = arith.constant 0 : index
    %c0_83 = arith.constant 0 : index
    %147 = vector.load %arg6[%c1_81, %c0_82, %c0_83] : memref<2x2x32xf32, #tpu.memory_space<vmem>>, vector<1x2x32xf32>
    %148 = vector.shape_cast %147 : vector<1x2x32xf32> to vector<2x32xf32>
    %149 = vector.shape_cast %141 : vector<2x32xf32> to vector<1x2x32xf32>
    tpu.vector_store %arg6[%c1_81, %c0_82, %c0_83], %149 {strides = array<i32>} : memref<2x2x32xf32, #tpu.memory_space<vmem>>, vector<1x2x32xf32>,
    %c1_84 = arith.constant 1 : index
    %c0_85 = arith.constant 0 : index
    %c0_86 = arith.constant 0 : index
    %150 = vector.load %arg4[%c1_84, %c0_85, %c0_86] : memref<8x2x32xf32, #tpu.memory_space<vmem>>, vector<1x2x32xf32>
    %151 = vector.shape_cast %150 : vector<1x2x32xf32> to vector<2x32xf32>
    %152 = vector.shape_cast %143 : vector<2x32xf32> to vector<1x2x32xf32>
    tpu.vector_store %arg4[%c1_84, %c0_85, %c0_86], %152 {strides = array<i32>} : memref<8x2x32xf32, #tpu.memory_space<vmem>>, vector<1x2x32xf32>,
    %c0_87 = arith.constant 0 : index
    %c0_88 = arith.constant 0 : index
    %c0_89 = arith.constant 0 : index
    %153 = vector.load %arg5[%c0_87, %c0_88, %c0_89] : memref<2x2x32xf32, #tpu.memory_space<vmem>>, vector<1x2x32xf32>
    %154 = vector.shape_cast %153 : vector<1x2x32xf32> to vector<2x32xf32>
    %c0_90 = arith.constant 0 : index
    %c0_91 = arith.constant 0 : index
    %c0_92 = arith.constant 0 : index
    %155 = vector.load %arg6[%c0_90, %c0_91, %c0_92] : memref<2x2x32xf32, #tpu.memory_space<vmem>>, vector<1x2x32xf32>
    %156 = vector.shape_cast %155 : vector<1x2x32xf32> to vector<2x32xf32>
    %157 = vector.extract_strided_slice %18 {offsets = [4, 0], sizes = [2, 128], strides = [1, 1]} : vector<16x128xf32> to vector<2x128xf32>
    %158 = vector.extract_strided_slice %10 {offsets = [32, 0], sizes = [32, 128], strides = [1, 1]} : vector<64x128xf32> to vector<32x128xf32>
    %cst_93 = arith.constant dense<0.000000e+00> : vector<2x128xf32>
    %159 = tpu.matmul %154, %158, %cst_93 {dimension_numbers = #tpu.dot_dimension_numbers<[1], [0], [0], [1], [0, 0, 1, 1], [], []>} : vector<2x32xf32>, vector<32x128xf32>, vector<2x128xf32> -> vector<2x128xf32>
    %160 = arith.addf %157, %159 : vector<2x128xf32>
    %161 = vector.broadcast %14 : vector<1x128xf32> to vector<2x128xf32>
    %162 = arith.addf %160, %161 : vector<2x128xf32>
    %163 = vector.extract_strided_slice %162 {offsets = [0, 0], sizes = [2, 96], strides = [1, 1]} : vector<2x128xf32> to vector<2x96xf32>
    %164 = arith.negf %163 : vector<2x96xf32>
    %165 = math.exp %164 : vector<2x96xf32>
    %cst_94 = arith.constant 1.000000e+00 : f32
    %166 = vector.broadcast %cst_94 : f32 to vector<2x96xf32>
    %167 = arith.addf %166, %165 : vector<2x96xf32>
    %168 = arith.divf %166, %167 : vector<2x96xf32>
    %169 = vector.extract_strided_slice %162 {offsets = [0, 96], sizes = [2, 32], strides = [1, 1]} : vector<2x128xf32> to vector<2x32xf32>
    %170 = math.tanh %169 : vector<2x32xf32>
    %171 = vector.extract_strided_slice %168 {offsets = [0, 0], sizes = [2, 32], strides = [1, 1]} : vector<2x96xf32> to vector<2x32xf32>
    %172 = vector.extract_strided_slice %168 {offsets = [0, 32], sizes = [2, 32], strides = [1, 1]} : vector<2x96xf32> to vector<2x32xf32>
    %173 = vector.extract_strided_slice %168 {offsets = [0, 64], sizes = [2, 32], strides = [1, 1]} : vector<2x96xf32> to vector<2x32xf32>
    %174 = arith.mulf %172, %156 : vector<2x32xf32>
    %175 = arith.mulf %171, %170 : vector<2x32xf32>
    %176 = arith.addf %174, %175 : vector<2x32xf32>
    %177 = math.tanh %176 : vector<2x32xf32>
    %178 = arith.mulf %173, %177 : vector<2x32xf32>
    %c0_95 = arith.constant 0 : index
    %c0_96 = arith.constant 0 : index
    %c0_97 = arith.constant 0 : index
    %179 = vector.load %arg5[%c0_95, %c0_96, %c0_97] : memref<2x2x32xf32, #tpu.memory_space<vmem>>, vector<1x2x32xf32>
    %180 = vector.shape_cast %179 : vector<1x2x32xf32> to vector<2x32xf32>
    %181 = vector.shape_cast %178 : vector<2x32xf32> to vector<1x2x32xf32>
    tpu.vector_store %arg5[%c0_95, %c0_96, %c0_97], %181 {strides = array<i32>} : memref<2x2x32xf32, #tpu.memory_space<vmem>>, vector<1x2x32xf32>,
    %c0_98 = arith.constant 0 : index
    %c0_99 = arith.constant 0 : index
    %c0_100 = arith.constant 0 : index
    %182 = vector.load %arg6[%c0_98, %c0_99, %c0_100] : memref<2x2x32xf32, #tpu.memory_space<vmem>>, vector<1x2x32xf32>
    %183 = vector.shape_cast %182 : vector<1x2x32xf32> to vector<2x32xf32>
    %184 = vector.shape_cast %176 : vector<2x32xf32> to vector<1x2x32xf32>
    tpu.vector_store %arg6[%c0_98, %c0_99, %c0_100], %184 {strides = array<i32>} : memref<2x2x32xf32, #tpu.memory_space<vmem>>, vector<1x2x32xf32>,
    %c1_101 = arith.constant 1 : index
    %c0_102 = arith.constant 0 : index
    %c0_103 = arith.constant 0 : index
    %185 = vector.load %arg5[%c1_101, %c0_102, %c0_103] : memref<2x2x32xf32, #tpu.memory_space<vmem>>, vector<1x2x32xf32>
    %186 = vector.shape_cast %185 : vector<1x2x32xf32> to vector<2x32xf32>
    %c1_104 = arith.constant 1 : index
    %c0_105 = arith.constant 0 : index
    %c0_106 = arith.constant 0 : index
    %187 = vector.load %arg6[%c1_104, %c0_105, %c0_106] : memref<2x2x32xf32, #tpu.memory_space<vmem>>, vector<1x2x32xf32>
    %188 = vector.shape_cast %187 : vector<1x2x32xf32> to vector<2x32xf32>
    %189 = tpu.concatenate %178, %186 in 1 : vector<2x32xf32>, vector<2x32xf32> -> vector<2x64xf32>
    %cst_107 = arith.constant dense<0.000000e+00> : vector<2x128xf32>
    %190 = tpu.matmul %189, %12, %cst_107 {dimension_numbers = #tpu.dot_dimension_numbers<[1], [0], [0], [1], [0, 0, 1, 1], [], []>} : vector<2x64xf32>, vector<64x128xf32>, vector<2x128xf32> -> vector<2x128xf32>
    %191 = vector.broadcast %16 : vector<1x128xf32> to vector<2x128xf32>
    %192 = arith.addf %190, %191 : vector<2x128xf32>
    %193 = vector.extract_strided_slice %192 {offsets = [0, 0], sizes = [2, 96], strides = [1, 1]} : vector<2x128xf32> to vector<2x96xf32>
    %194 = arith.negf %193 : vector<2x96xf32>
    %195 = math.exp %194 : vector<2x96xf32>
    %cst_108 = arith.constant 1.000000e+00 : f32
    %196 = vector.broadcast %cst_108 : f32 to vector<2x96xf32>
    %197 = arith.addf %196, %195 : vector<2x96xf32>
    %198 = arith.divf %196, %197 : vector<2x96xf32>
    %199 = vector.extract_strided_slice %192 {offsets = [0, 96], sizes = [2, 32], strides = [1, 1]} : vector<2x128xf32> to vector<2x32xf32>
    %200 = math.tanh %199 : vector<2x32xf32>
    %201 = vector.extract_strided_slice %198 {offsets = [0, 0], sizes = [2, 32], strides = [1, 1]} : vector<2x96xf32> to vector<2x32xf32>
    %202 = vector.extract_strided_slice %198 {offsets = [0, 32], sizes = [2, 32], strides = [1, 1]} : vector<2x96xf32> to vector<2x32xf32>
    %203 = vector.extract_strided_slice %198 {offsets = [0, 64], sizes = [2, 32], strides = [1, 1]} : vector<2x96xf32> to vector<2x32xf32>
    %204 = arith.mulf %202, %188 : vector<2x32xf32>
    %205 = arith.mulf %201, %200 : vector<2x32xf32>
    %206 = arith.addf %204, %205 : vector<2x32xf32>
    %207 = math.tanh %206 : vector<2x32xf32>
    %208 = arith.mulf %203, %207 : vector<2x32xf32>
    %c1_109 = arith.constant 1 : index
    %c0_110 = arith.constant 0 : index
    %c0_111 = arith.constant 0 : index
    %209 = vector.load %arg5[%c1_109, %c0_110, %c0_111] : memref<2x2x32xf32, #tpu.memory_space<vmem>>, vector<1x2x32xf32>
    %210 = vector.shape_cast %209 : vector<1x2x32xf32> to vector<2x32xf32>
    %211 = vector.shape_cast %208 : vector<2x32xf32> to vector<1x2x32xf32>
    tpu.vector_store %arg5[%c1_109, %c0_110, %c0_111], %211 {strides = array<i32>} : memref<2x2x32xf32, #tpu.memory_space<vmem>>, vector<1x2x32xf32>,
    %c1_112 = arith.constant 1 : index
    %c0_113 = arith.constant 0 : index
    %c0_114 = arith.constant 0 : index
    %212 = vector.load %arg6[%c1_112, %c0_113, %c0_114] : memref<2x2x32xf32, #tpu.memory_space<vmem>>, vector<1x2x32xf32>
    %213 = vector.shape_cast %212 : vector<1x2x32xf32> to vector<2x32xf32>
    %214 = vector.shape_cast %206 : vector<2x32xf32> to vector<1x2x32xf32>
    tpu.vector_store %arg6[%c1_112, %c0_113, %c0_114], %214 {strides = array<i32>} : memref<2x2x32xf32, #tpu.memory_space<vmem>>, vector<1x2x32xf32>,
    %c2 = arith.constant 2 : index
    %c0_115 = arith.constant 0 : index
    %c0_116 = arith.constant 0 : index
    %215 = vector.load %arg4[%c2, %c0_115, %c0_116] : memref<8x2x32xf32, #tpu.memory_space<vmem>>, vector<1x2x32xf32>
    %216 = vector.shape_cast %215 : vector<1x2x32xf32> to vector<2x32xf32>
    %217 = vector.shape_cast %208 : vector<2x32xf32> to vector<1x2x32xf32>
    tpu.vector_store %arg4[%c2, %c0_115, %c0_116], %217 {strides = array<i32>} : memref<8x2x32xf32, #tpu.memory_space<vmem>>, vector<1x2x32xf32>,
    %c0_117 = arith.constant 0 : index
    %c0_118 = arith.constant 0 : index
    %c0_119 = arith.constant 0 : index
    %218 = vector.load %arg5[%c0_117, %c0_118, %c0_119] : memref<2x2x32xf32, #tpu.memory_space<vmem>>, vector<1x2x32xf32>
    %219 = vector.shape_cast %218 : vector<1x2x32xf32> to vector<2x32xf32>
    %c0_120 = arith.constant 0 : index
    %c0_121 = arith.constant 0 : index
    %c0_122 = arith.constant 0 : index
    %220 = vector.load %arg6[%c0_120, %c0_121, %c0_122] : memref<2x2x32xf32, #tpu.memory_space<vmem>>, vector<1x2x32xf32>
    %221 = vector.shape_cast %220 : vector<1x2x32xf32> to vector<2x32xf32>
    %222 = vector.extract_strided_slice %18 {offsets = [6, 0], sizes = [2, 128], strides = [1, 1]} : vector<16x128xf32> to vector<2x128xf32>
    %223 = vector.extract_strided_slice %10 {offsets = [32, 0], sizes = [32, 128], strides = [1, 1]} : vector<64x128xf32> to vector<32x128xf32>
    %cst_123 = arith.constant dense<0.000000e+00> : vector<2x128xf32>
    %224 = tpu.matmul %219, %223, %cst_123 {dimension_numbers = #tpu.dot_dimension_numbers<[1], [0], [0], [1], [0, 0, 1, 1], [], []>} : vector<2x32xf32>, vector<32x128xf32>, vector<2x128xf32> -> vector<2x128xf32>
    %225 = arith.addf %222, %224 : vector<2x128xf32>
    %226 = vector.broadcast %14 : vector<1x128xf32> to vector<2x128xf32>
    %227 = arith.addf %225, %226 : vector<2x128xf32>
    %228 = vector.extract_strided_slice %227 {offsets = [0, 0], sizes = [2, 96], strides = [1, 1]} : vector<2x128xf32> to vector<2x96xf32>
    %229 = arith.negf %228 : vector<2x96xf32>
    %230 = math.exp %229 : vector<2x96xf32>
    %cst_124 = arith.constant 1.000000e+00 : f32
    %231 = vector.broadcast %cst_124 : f32 to vector<2x96xf32>
    %232 = arith.addf %231, %230 : vector<2x96xf32>
    %233 = arith.divf %231, %232 : vector<2x96xf32>
    %234 = vector.extract_strided_slice %227 {offsets = [0, 96], sizes = [2, 32], strides = [1, 1]} : vector<2x128xf32> to vector<2x32xf32>
    %235 = math.tanh %234 : vector<2x32xf32>
    %236 = vector.extract_strided_slice %233 {offsets = [0, 0], sizes = [2, 32], strides = [1, 1]} : vector<2x96xf32> to vector<2x32xf32>
    %237 = vector.extract_strided_slice %233 {offsets = [0, 32], sizes = [2, 32], strides = [1, 1]} : vector<2x96xf32> to vector<2x32xf32>
    %238 = vector.extract_strided_slice %233 {offsets = [0, 64], sizes = [2, 32], strides = [1, 1]} : vector<2x96xf32> to vector<2x32xf32>
    %239 = arith.mulf %237, %221 : vector<2x32xf32>
    %240 = arith.mulf %236, %235 : vector<2x32xf32>
    %241 = arith.addf %239, %240 : vector<2x32xf32>
    %242 = math.tanh %241 : vector<2x32xf32>
    %243 = arith.mulf %238, %242 : vector<2x32xf32>
    %c0_125 = arith.constant 0 : index
    %c0_126 = arith.constant 0 : index
    %c0_127 = arith.constant 0 : index
    %244 = vector.load %arg5[%c0_125, %c0_126, %c0_127] : memref<2x2x32xf32, #tpu.memory_space<vmem>>, vector<1x2x32xf32>
    %245 = vector.shape_cast %244 : vector<1x2x32xf32> to vector<2x32xf32>
    %246 = vector.shape_cast %243 : vector<2x32xf32> to vector<1x2x32xf32>
    tpu.vector_store %arg5[%c0_125, %c0_126, %c0_127], %246 {strides = array<i32>} : memref<2x2x32xf32, #tpu.memory_space<vmem>>, vector<1x2x32xf32>,
    %c0_128 = arith.constant 0 : index
    %c0_129 = arith.constant 0 : index
    %c0_130 = arith.constant 0 : index
    %247 = vector.load %arg6[%c0_128, %c0_129, %c0_130] : memref<2x2x32xf32, #tpu.memory_space<vmem>>, vector<1x2x32xf32>
    %248 = vector.shape_cast %247 : vector<1x2x32xf32> to vector<2x32xf32>
    %249 = vector.shape_cast %241 : vector<2x32xf32> to vector<1x2x32xf32>
    tpu.vector_store %arg6[%c0_128, %c0_129, %c0_130], %249 {strides = array<i32>} : memref<2x2x32xf32, #tpu.memory_space<vmem>>, vector<1x2x32xf32>,
    %c1_131 = arith.constant 1 : index
    %c0_132 = arith.constant 0 : index
    %c0_133 = arith.constant 0 : index
    %250 = vector.load %arg5[%c1_131, %c0_132, %c0_133] : memref<2x2x32xf32, #tpu.memory_space<vmem>>, vector<1x2x32xf32>
    %251 = vector.shape_cast %250 : vector<1x2x32xf32> to vector<2x32xf32>
    %c1_134 = arith.constant 1 : index
    %c0_135 = arith.constant 0 : index
    %c0_136 = arith.constant 0 : index
    %252 = vector.load %arg6[%c1_134, %c0_135, %c0_136] : memref<2x2x32xf32, #tpu.memory_space<vmem>>, vector<1x2x32xf32>
    %253 = vector.shape_cast %252 : vector<1x2x32xf32> to vector<2x32xf32>
    %254 = tpu.concatenate %243, %251 in 1 : vector<2x32xf32>, vector<2x32xf32> -> vector<2x64xf32>
    %cst_137 = arith.constant dense<0.000000e+00> : vector<2x128xf32>
    %255 = tpu.matmul %254, %12, %cst_137 {dimension_numbers = #tpu.dot_dimension_numbers<[1], [0], [0], [1], [0, 0, 1, 1], [], []>} : vector<2x64xf32>, vector<64x128xf32>, vector<2x128xf32> -> vector<2x128xf32>
    %256 = vector.broadcast %16 : vector<1x128xf32> to vector<2x128xf32>
    %257 = arith.addf %255, %256 : vector<2x128xf32>
    %258 = vector.extract_strided_slice %257 {offsets = [0, 0], sizes = [2, 96], strides = [1, 1]} : vector<2x128xf32> to vector<2x96xf32>
    %259 = arith.negf %258 : vector<2x96xf32>
    %260 = math.exp %259 : vector<2x96xf32>
    %cst_138 = arith.constant 1.000000e+00 : f32
    %261 = vector.broadcast %cst_138 : f32 to vector<2x96xf32>
    %262 = arith.addf %261, %260 : vector<2x96xf32>
    %263 = arith.divf %261, %262 : vector<2x96xf32>
    %264 = vector.extract_strided_slice %257 {offsets = [0, 96], sizes = [2, 32], strides = [1, 1]} : vector<2x128xf32> to vector<2x32xf32>
    %265 = math.tanh %264 : vector<2x32xf32>
    %266 = vector.extract_strided_slice %263 {offsets = [0, 0], sizes = [2, 32], strides = [1, 1]} : vector<2x96xf32> to vector<2x32xf32>
    %267 = vector.extract_strided_slice %263 {offsets = [0, 32], sizes = [2, 32], strides = [1, 1]} : vector<2x96xf32> to vector<2x32xf32>
    %268 = vector.extract_strided_slice %263 {offsets = [0, 64], sizes = [2, 32], strides = [1, 1]} : vector<2x96xf32> to vector<2x32xf32>
    %269 = arith.mulf %267, %253 : vector<2x32xf32>
    %270 = arith.mulf %266, %265 : vector<2x32xf32>
    %271 = arith.addf %269, %270 : vector<2x32xf32>
    %272 = math.tanh %271 : vector<2x32xf32>
    %273 = arith.mulf %268, %272 : vector<2x32xf32>
    %c1_139 = arith.constant 1 : index
    %c0_140 = arith.constant 0 : index
    %c0_141 = arith.constant 0 : index
    %274 = vector.load %arg5[%c1_139, %c0_140, %c0_141] : memref<2x2x32xf32, #tpu.memory_space<vmem>>, vector<1x2x32xf32>
    %275 = vector.shape_cast %274 : vector<1x2x32xf32> to vector<2x32xf32>
    %276 = vector.shape_cast %273 : vector<2x32xf32> to vector<1x2x32xf32>
    tpu.vector_store %arg5[%c1_139, %c0_140, %c0_141], %276 {strides = array<i32>} : memref<2x2x32xf32, #tpu.memory_space<vmem>>, vector<1x2x32xf32>,
    %c1_142 = arith.constant 1 : index
    %c0_143 = arith.constant 0 : index
    %c0_144 = arith.constant 0 : index
    %277 = vector.load %arg6[%c1_142, %c0_143, %c0_144] : memref<2x2x32xf32, #tpu.memory_space<vmem>>, vector<1x2x32xf32>
    %278 = vector.shape_cast %277 : vector<1x2x32xf32> to vector<2x32xf32>
    %279 = vector.shape_cast %271 : vector<2x32xf32> to vector<1x2x32xf32>
    tpu.vector_store %arg6[%c1_142, %c0_143, %c0_144], %279 {strides = array<i32>} : memref<2x2x32xf32, #tpu.memory_space<vmem>>, vector<1x2x32xf32>,
    %c3 = arith.constant 3 : index
    %c0_145 = arith.constant 0 : index
    %c0_146 = arith.constant 0 : index
    %280 = vector.load %arg4[%c3, %c0_145, %c0_146] : memref<8x2x32xf32, #tpu.memory_space<vmem>>, vector<1x2x32xf32>
    %281 = vector.shape_cast %280 : vector<1x2x32xf32> to vector<2x32xf32>
    %282 = vector.shape_cast %273 : vector<2x32xf32> to vector<1x2x32xf32>
    tpu.vector_store %arg4[%c3, %c0_145, %c0_146], %282 {strides = array<i32>} : memref<8x2x32xf32, #tpu.memory_space<vmem>>, vector<1x2x32xf32>,
    %c0_147 = arith.constant 0 : index
    %c0_148 = arith.constant 0 : index
    %c0_149 = arith.constant 0 : index
    %283 = vector.load %arg5[%c0_147, %c0_148, %c0_149] : memref<2x2x32xf32, #tpu.memory_space<vmem>>, vector<1x2x32xf32>
    %284 = vector.shape_cast %283 : vector<1x2x32xf32> to vector<2x32xf32>
    %c0_150 = arith.constant 0 : index
    %c0_151 = arith.constant 0 : index
    %c0_152 = arith.constant 0 : index
    %285 = vector.load %arg6[%c0_150, %c0_151, %c0_152] : memref<2x2x32xf32, #tpu.memory_space<vmem>>, vector<1x2x32xf32>
    %286 = vector.shape_cast %285 : vector<1x2x32xf32> to vector<2x32xf32>
    %287 = vector.extract_strided_slice %18 {offsets = [8, 0], sizes = [2, 128], strides = [1, 1]} : vector<16x128xf32> to vector<2x128xf32>
    %288 = vector.extract_strided_slice %10 {offsets = [32, 0], sizes = [32, 128], strides = [1, 1]} : vector<64x128xf32> to vector<32x128xf32>
    %cst_153 = arith.constant dense<0.000000e+00> : vector<2x128xf32>
    %289 = tpu.matmul %284, %288, %cst_153 {dimension_numbers = #tpu.dot_dimension_numbers<[1], [0], [0], [1], [0, 0, 1, 1], [], []>} : vector<2x32xf32>, vector<32x128xf32>, vector<2x128xf32> -> vector<2x128xf32>
    %290 = arith.addf %287, %289 : vector<2x128xf32>
    %291 = vector.broadcast %14 : vector<1x128xf32> to vector<2x128xf32>
    %292 = arith.addf %290, %291 : vector<2x128xf32>
    %293 = vector.extract_strided_slice %292 {offsets = [0, 0], sizes = [2, 96], strides = [1, 1]} : vector<2x128xf32> to vector<2x96xf32>
    %294 = arith.negf %293 : vector<2x96xf32>
    %295 = math.exp %294 : vector<2x96xf32>
    %cst_154 = arith.constant 1.000000e+00 : f32
    %296 = vector.broadcast %cst_154 : f32 to vector<2x96xf32>
    %297 = arith.addf %296, %295 : vector<2x96xf32>
    %298 = arith.divf %296, %297 : vector<2x96xf32>
    %299 = vector.extract_strided_slice %292 {offsets = [0, 96], sizes = [2, 32], strides = [1, 1]} : vector<2x128xf32> to vector<2x32xf32>
    %300 = math.tanh %299 : vector<2x32xf32>
    %301 = vector.extract_strided_slice %298 {offsets = [0, 0], sizes = [2, 32], strides = [1, 1]} : vector<2x96xf32> to vector<2x32xf32>
    %302 = vector.extract_strided_slice %298 {offsets = [0, 32], sizes = [2, 32], strides = [1, 1]} : vector<2x96xf32> to vector<2x32xf32>
    %303 = vector.extract_strided_slice %298 {offsets = [0, 64], sizes = [2, 32], strides = [1, 1]} : vector<2x96xf32> to vector<2x32xf32>
    %304 = arith.mulf %302, %286 : vector<2x32xf32>
    %305 = arith.mulf %301, %300 : vector<2x32xf32>
    %306 = arith.addf %304, %305 : vector<2x32xf32>
    %307 = math.tanh %306 : vector<2x32xf32>
    %308 = arith.mulf %303, %307 : vector<2x32xf32>
    %c0_155 = arith.constant 0 : index
    %c0_156 = arith.constant 0 : index
    %c0_157 = arith.constant 0 : index
    %309 = vector.load %arg5[%c0_155, %c0_156, %c0_157] : memref<2x2x32xf32, #tpu.memory_space<vmem>>, vector<1x2x32xf32>
    %310 = vector.shape_cast %309 : vector<1x2x32xf32> to vector<2x32xf32>
    %311 = vector.shape_cast %308 : vector<2x32xf32> to vector<1x2x32xf32>
    tpu.vector_store %arg5[%c0_155, %c0_156, %c0_157], %311 {strides = array<i32>} : memref<2x2x32xf32, #tpu.memory_space<vmem>>, vector<1x2x32xf32>,
    %c0_158 = arith.constant 0 : index
    %c0_159 = arith.constant 0 : index
    %c0_160 = arith.constant 0 : index
    %312 = vector.load %arg6[%c0_158, %c0_159, %c0_160] : memref<2x2x32xf32, #tpu.memory_space<vmem>>, vector<1x2x32xf32>
    %313 = vector.shape_cast %312 : vector<1x2x32xf32> to vector<2x32xf32>
    %314 = vector.shape_cast %306 : vector<2x32xf32> to vector<1x2x32xf32>
    tpu.vector_store %arg6[%c0_158, %c0_159, %c0_160], %314 {strides = array<i32>} : memref<2x2x32xf32, #tpu.memory_space<vmem>>, vector<1x2x32xf32>,
    %c1_161 = arith.constant 1 : index
    %c0_162 = arith.constant 0 : index
    %c0_163 = arith.constant 0 : index
    %315 = vector.load %arg5[%c1_161, %c0_162, %c0_163] : memref<2x2x32xf32, #tpu.memory_space<vmem>>, vector<1x2x32xf32>
    %316 = vector.shape_cast %315 : vector<1x2x32xf32> to vector<2x32xf32>
    %c1_164 = arith.constant 1 : index
    %c0_165 = arith.constant 0 : index
    %c0_166 = arith.constant 0 : index
    %317 = vector.load %arg6[%c1_164, %c0_165, %c0_166] : memref<2x2x32xf32, #tpu.memory_space<vmem>>, vector<1x2x32xf32>
    %318 = vector.shape_cast %317 : vector<1x2x32xf32> to vector<2x32xf32>
    %319 = tpu.concatenate %308, %316 in 1 : vector<2x32xf32>, vector<2x32xf32> -> vector<2x64xf32>
    %cst_167 = arith.constant dense<0.000000e+00> : vector<2x128xf32>
    %320 = tpu.matmul %319, %12, %cst_167 {dimension_numbers = #tpu.dot_dimension_numbers<[1], [0], [0], [1], [0, 0, 1, 1], [], []>} : vector<2x64xf32>, vector<64x128xf32>, vector<2x128xf32> -> vector<2x128xf32>
    %321 = vector.broadcast %16 : vector<1x128xf32> to vector<2x128xf32>
    %322 = arith.addf %320, %321 : vector<2x128xf32>
    %323 = vector.extract_strided_slice %322 {offsets = [0, 0], sizes = [2, 96], strides = [1, 1]} : vector<2x128xf32> to vector<2x96xf32>
    %324 = arith.negf %323 : vector<2x96xf32>
    %325 = math.exp %324 : vector<2x96xf32>
    %cst_168 = arith.constant 1.000000e+00 : f32
    %326 = vector.broadcast %cst_168 : f32 to vector<2x96xf32>
    %327 = arith.addf %326, %325 : vector<2x96xf32>
    %328 = arith.divf %326, %327 : vector<2x96xf32>
    %329 = vector.extract_strided_slice %322 {offsets = [0, 96], sizes = [2, 32], strides = [1, 1]} : vector<2x128xf32> to vector<2x32xf32>
    %330 = math.tanh %329 : vector<2x32xf32>
    %331 = vector.extract_strided_slice %328 {offsets = [0, 0], sizes = [2, 32], strides = [1, 1]} : vector<2x96xf32> to vector<2x32xf32>
    %332 = vector.extract_strided_slice %328 {offsets = [0, 32], sizes = [2, 32], strides = [1, 1]} : vector<2x96xf32> to vector<2x32xf32>
    %333 = vector.extract_strided_slice %328 {offsets = [0, 64], sizes = [2, 32], strides = [1, 1]} : vector<2x96xf32> to vector<2x32xf32>
    %334 = arith.mulf %332, %318 : vector<2x32xf32>
    %335 = arith.mulf %331, %330 : vector<2x32xf32>
    %336 = arith.addf %334, %335 : vector<2x32xf32>
    %337 = math.tanh %336 : vector<2x32xf32>
    %338 = arith.mulf %333, %337 : vector<2x32xf32>
    %c1_169 = arith.constant 1 : index
    %c0_170 = arith.constant 0 : index
    %c0_171 = arith.constant 0 : index
    %339 = vector.load %arg5[%c1_169, %c0_170, %c0_171] : memref<2x2x32xf32, #tpu.memory_space<vmem>>, vector<1x2x32xf32>
    %340 = vector.shape_cast %339 : vector<1x2x32xf32> to vector<2x32xf32>
    %341 = vector.shape_cast %338 : vector<2x32xf32> to vector<1x2x32xf32>
    tpu.vector_store %arg5[%c1_169, %c0_170, %c0_171], %341 {strides = array<i32>} : memref<2x2x32xf32, #tpu.memory_space<vmem>>, vector<1x2x32xf32>,
    %c1_172 = arith.constant 1 : index
    %c0_173 = arith.constant 0 : index
    %c0_174 = arith.constant 0 : index
    %342 = vector.load %arg6[%c1_172, %c0_173, %c0_174] : memref<2x2x32xf32, #tpu.memory_space<vmem>>, vector<1x2x32xf32>
    %343 = vector.shape_cast %342 : vector<1x2x32xf32> to vector<2x32xf32>
    %344 = vector.shape_cast %336 : vector<2x32xf32> to vector<1x2x32xf32>
    tpu.vector_store %arg6[%c1_172, %c0_173, %c0_174], %344 {strides = array<i32>} : memref<2x2x32xf32, #tpu.memory_space<vmem>>, vector<1x2x32xf32>,
    %c4 = arith.constant 4 : index
    %c0_175 = arith.constant 0 : index
    %c0_176 = arith.constant 0 : index
    %345 = vector.load %arg4[%c4, %c0_175, %c0_176] : memref<8x2x32xf32, #tpu.memory_space<vmem>>, vector<1x2x32xf32>
    %346 = vector.shape_cast %345 : vector<1x2x32xf32> to vector<2x32xf32>
    %347 = vector.shape_cast %338 : vector<2x32xf32> to vector<1x2x32xf32>
    tpu.vector_store %arg4[%c4, %c0_175, %c0_176], %347 {strides = array<i32>} : memref<8x2x32xf32, #tpu.memory_space<vmem>>, vector<1x2x32xf32>,
    %c0_177 = arith.constant 0 : index
    %c0_178 = arith.constant 0 : index
    %c0_179 = arith.constant 0 : index
    %348 = vector.load %arg5[%c0_177, %c0_178, %c0_179] : memref<2x2x32xf32, #tpu.memory_space<vmem>>, vector<1x2x32xf32>
    %349 = vector.shape_cast %348 : vector<1x2x32xf32> to vector<2x32xf32>
    %c0_180 = arith.constant 0 : index
    %c0_181 = arith.constant 0 : index
    %c0_182 = arith.constant 0 : index
    %350 = vector.load %arg6[%c0_180, %c0_181, %c0_182] : memref<2x2x32xf32, #tpu.memory_space<vmem>>, vector<1x2x32xf32>
    %351 = vector.shape_cast %350 : vector<1x2x32xf32> to vector<2x32xf32>
    %352 = vector.extract_strided_slice %18 {offsets = [10, 0], sizes = [2, 128], strides = [1, 1]} : vector<16x128xf32> to vector<2x128xf32>
    %353 = vector.extract_strided_slice %10 {offsets = [32, 0], sizes = [32, 128], strides = [1, 1]} : vector<64x128xf32> to vector<32x128xf32>
    %cst_183 = arith.constant dense<0.000000e+00> : vector<2x128xf32>
    %354 = tpu.matmul %349, %353, %cst_183 {dimension_numbers = #tpu.dot_dimension_numbers<[1], [0], [0], [1], [0, 0, 1, 1], [], []>} : vector<2x32xf32>, vector<32x128xf32>, vector<2x128xf32> -> vector<2x128xf32>
    %355 = arith.addf %352, %354 : vector<2x128xf32>
    %356 = vector.broadcast %14 : vector<1x128xf32> to vector<2x128xf32>
    %357 = arith.addf %355, %356 : vector<2x128xf32>
    %358 = vector.extract_strided_slice %357 {offsets = [0, 0], sizes = [2, 96], strides = [1, 1]} : vector<2x128xf32> to vector<2x96xf32>
    %359 = arith.negf %358 : vector<2x96xf32>
    %360 = math.exp %359 : vector<2x96xf32>
    %cst_184 = arith.constant 1.000000e+00 : f32
    %361 = vector.broadcast %cst_184 : f32 to vector<2x96xf32>
    %362 = arith.addf %361, %360 : vector<2x96xf32>
    %363 = arith.divf %361, %362 : vector<2x96xf32>
    %364 = vector.extract_strided_slice %357 {offsets = [0, 96], sizes = [2, 32], strides = [1, 1]} : vector<2x128xf32> to vector<2x32xf32>
    %365 = math.tanh %364 : vector<2x32xf32>
    %366 = vector.extract_strided_slice %363 {offsets = [0, 0], sizes = [2, 32], strides = [1, 1]} : vector<2x96xf32> to vector<2x32xf32>
    %367 = vector.extract_strided_slice %363 {offsets = [0, 32], sizes = [2, 32], strides = [1, 1]} : vector<2x96xf32> to vector<2x32xf32>
    %368 = vector.extract_strided_slice %363 {offsets = [0, 64], sizes = [2, 32], strides = [1, 1]} : vector<2x96xf32> to vector<2x32xf32>
    %369 = arith.mulf %367, %351 : vector<2x32xf32>
    %370 = arith.mulf %366, %365 : vector<2x32xf32>
    %371 = arith.addf %369, %370 : vector<2x32xf32>
    %372 = math.tanh %371 : vector<2x32xf32>
    %373 = arith.mulf %368, %372 : vector<2x32xf32>
    %c0_185 = arith.constant 0 : index
    %c0_186 = arith.constant 0 : index
    %c0_187 = arith.constant 0 : index
    %374 = vector.load %arg5[%c0_185, %c0_186, %c0_187] : memref<2x2x32xf32, #tpu.memory_space<vmem>>, vector<1x2x32xf32>
    %375 = vector.shape_cast %374 : vector<1x2x32xf32> to vector<2x32xf32>
    %376 = vector.shape_cast %373 : vector<2x32xf32> to vector<1x2x32xf32>
    tpu.vector_store %arg5[%c0_185, %c0_186, %c0_187], %376 {strides = array<i32>} : memref<2x2x32xf32, #tpu.memory_space<vmem>>, vector<1x2x32xf32>,
    %c0_188 = arith.constant 0 : index
    %c0_189 = arith.constant 0 : index
    %c0_190 = arith.constant 0 : index
    %377 = vector.load %arg6[%c0_188, %c0_189, %c0_190] : memref<2x2x32xf32, #tpu.memory_space<vmem>>, vector<1x2x32xf32>
    %378 = vector.shape_cast %377 : vector<1x2x32xf32> to vector<2x32xf32>
    %379 = vector.shape_cast %371 : vector<2x32xf32> to vector<1x2x32xf32>
    tpu.vector_store %arg6[%c0_188, %c0_189, %c0_190], %379 {strides = array<i32>} : memref<2x2x32xf32, #tpu.memory_space<vmem>>, vector<1x2x32xf32>,
    %c1_191 = arith.constant 1 : index
    %c0_192 = arith.constant 0 : index
    %c0_193 = arith.constant 0 : index
    %380 = vector.load %arg5[%c1_191, %c0_192, %c0_193] : memref<2x2x32xf32, #tpu.memory_space<vmem>>, vector<1x2x32xf32>
    %381 = vector.shape_cast %380 : vector<1x2x32xf32> to vector<2x32xf32>
    %c1_194 = arith.constant 1 : index
    %c0_195 = arith.constant 0 : index
    %c0_196 = arith.constant 0 : index
    %382 = vector.load %arg6[%c1_194, %c0_195, %c0_196] : memref<2x2x32xf32, #tpu.memory_space<vmem>>, vector<1x2x32xf32>
    %383 = vector.shape_cast %382 : vector<1x2x32xf32> to vector<2x32xf32>
    %384 = tpu.concatenate %373, %381 in 1 : vector<2x32xf32>, vector<2x32xf32> -> vector<2x64xf32>
    %cst_197 = arith.constant dense<0.000000e+00> : vector<2x128xf32>
    %385 = tpu.matmul %384, %12, %cst_197 {dimension_numbers = #tpu.dot_dimension_numbers<[1], [0], [0], [1], [0, 0, 1, 1], [], []>} : vector<2x64xf32>, vector<64x128xf32>, vector<2x128xf32> -> vector<2x128xf32>
    %386 = vector.broadcast %16 : vector<1x128xf32> to vector<2x128xf32>
    %387 = arith.addf %385, %386 : vector<2x128xf32>
    %388 = vector.extract_strided_slice %387 {offsets = [0, 0], sizes = [2, 96], strides = [1, 1]} : vector<2x128xf32> to vector<2x96xf32>
    %389 = arith.negf %388 : vector<2x96xf32>
    %390 = math.exp %389 : vector<2x96xf32>
    %cst_198 = arith.constant 1.000000e+00 : f32
    %391 = vector.broadcast %cst_198 : f32 to vector<2x96xf32>
    %392 = arith.addf %391, %390 : vector<2x96xf32>
    %393 = arith.divf %391, %392 : vector<2x96xf32>
    %394 = vector.extract_strided_slice %387 {offsets = [0, 96], sizes = [2, 32], strides = [1, 1]} : vector<2x128xf32> to vector<2x32xf32>
    %395 = math.tanh %394 : vector<2x32xf32>
    %396 = vector.extract_strided_slice %393 {offsets = [0, 0], sizes = [2, 32], strides = [1, 1]} : vector<2x96xf32> to vector<2x32xf32>
    %397 = vector.extract_strided_slice %393 {offsets = [0, 32], sizes = [2, 32], strides = [1, 1]} : vector<2x96xf32> to vector<2x32xf32>
    %398 = vector.extract_strided_slice %393 {offsets = [0, 64], sizes = [2, 32], strides = [1, 1]} : vector<2x96xf32> to vector<2x32xf32>
    %399 = arith.mulf %397, %383 : vector<2x32xf32>
    %400 = arith.mulf %396, %395 : vector<2x32xf32>
    %401 = arith.addf %399, %400 : vector<2x32xf32>
    %402 = math.tanh %401 : vector<2x32xf32>
    %403 = arith.mulf %398, %402 : vector<2x32xf32>
    %c1_199 = arith.constant 1 : index
    %c0_200 = arith.constant 0 : index
    %c0_201 = arith.constant 0 : index
    %404 = vector.load %arg5[%c1_199, %c0_200, %c0_201] : memref<2x2x32xf32, #tpu.memory_space<vmem>>, vector<1x2x32xf32>
    %405 = vector.shape_cast %404 : vector<1x2x32xf32> to vector<2x32xf32>
    %406 = vector.shape_cast %403 : vector<2x32xf32> to vector<1x2x32xf32>
    tpu.vector_store %arg5[%c1_199, %c0_200, %c0_201], %406 {strides = array<i32>} : memref<2x2x32xf32, #tpu.memory_space<vmem>>, vector<1x2x32xf32>,
    %c1_202 = arith.constant 1 : index
    %c0_203 = arith.constant 0 : index
    %c0_204 = arith.constant 0 : index
    %407 = vector.load %arg6[%c1_202, %c0_203, %c0_204] : memref<2x2x32xf32, #tpu.memory_space<vmem>>, vector<1x2x32xf32>
    %408 = vector.shape_cast %407 : vector<1x2x32xf32> to vector<2x32xf32>
    %409 = vector.shape_cast %401 : vector<2x32xf32> to vector<1x2x32xf32>
    tpu.vector_store %arg6[%c1_202, %c0_203, %c0_204], %409 {strides = array<i32>} : memref<2x2x32xf32, #tpu.memory_space<vmem>>, vector<1x2x32xf32>,
    %c5 = arith.constant 5 : index
    %c0_205 = arith.constant 0 : index
    %c0_206 = arith.constant 0 : index
    %410 = vector.load %arg4[%c5, %c0_205, %c0_206] : memref<8x2x32xf32, #tpu.memory_space<vmem>>, vector<1x2x32xf32>
    %411 = vector.shape_cast %410 : vector<1x2x32xf32> to vector<2x32xf32>
    %412 = vector.shape_cast %403 : vector<2x32xf32> to vector<1x2x32xf32>
    tpu.vector_store %arg4[%c5, %c0_205, %c0_206], %412 {strides = array<i32>} : memref<8x2x32xf32, #tpu.memory_space<vmem>>, vector<1x2x32xf32>,
    %c0_207 = arith.constant 0 : index
    %c0_208 = arith.constant 0 : index
    %c0_209 = arith.constant 0 : index
    %413 = vector.load %arg5[%c0_207, %c0_208, %c0_209] : memref<2x2x32xf32, #tpu.memory_space<vmem>>, vector<1x2x32xf32>
    %414 = vector.shape_cast %413 : vector<1x2x32xf32> to vector<2x32xf32>
    %c0_210 = arith.constant 0 : index
    %c0_211 = arith.constant 0 : index
    %c0_212 = arith.constant 0 : index
    %415 = vector.load %arg6[%c0_210, %c0_211, %c0_212] : memref<2x2x32xf32, #tpu.memory_space<vmem>>, vector<1x2x32xf32>
    %416 = vector.shape_cast %415 : vector<1x2x32xf32> to vector<2x32xf32>
    %417 = vector.extract_strided_slice %18 {offsets = [12, 0], sizes = [2, 128], strides = [1, 1]} : vector<16x128xf32> to vector<2x128xf32>
    %418 = vector.extract_strided_slice %10 {offsets = [32, 0], sizes = [32, 128], strides = [1, 1]} : vector<64x128xf32> to vector<32x128xf32>
    %cst_213 = arith.constant dense<0.000000e+00> : vector<2x128xf32>
    %419 = tpu.matmul %414, %418, %cst_213 {dimension_numbers = #tpu.dot_dimension_numbers<[1], [0], [0], [1], [0, 0, 1, 1], [], []>} : vector<2x32xf32>, vector<32x128xf32>, vector<2x128xf32> -> vector<2x128xf32>
    %420 = arith.addf %417, %419 : vector<2x128xf32>
    %421 = vector.broadcast %14 : vector<1x128xf32> to vector<2x128xf32>
    %422 = arith.addf %420, %421 : vector<2x128xf32>
    %423 = vector.extract_strided_slice %422 {offsets = [0, 0], sizes = [2, 96], strides = [1, 1]} : vector<2x128xf32> to vector<2x96xf32>
    %424 = arith.negf %423 : vector<2x96xf32>
    %425 = math.exp %424 : vector<2x96xf32>
    %cst_214 = arith.constant 1.000000e+00 : f32
    %426 = vector.broadcast %cst_214 : f32 to vector<2x96xf32>
    %427 = arith.addf %426, %425 : vector<2x96xf32>
    %428 = arith.divf %426, %427 : vector<2x96xf32>
    %429 = vector.extract_strided_slice %422 {offsets = [0, 96], sizes = [2, 32], strides = [1, 1]} : vector<2x128xf32> to vector<2x32xf32>
    %430 = math.tanh %429 : vector<2x32xf32>
    %431 = vector.extract_strided_slice %428 {offsets = [0, 0], sizes = [2, 32], strides = [1, 1]} : vector<2x96xf32> to vector<2x32xf32>
    %432 = vector.extract_strided_slice %428 {offsets = [0, 32], sizes = [2, 32], strides = [1, 1]} : vector<2x96xf32> to vector<2x32xf32>
    %433 = vector.extract_strided_slice %428 {offsets = [0, 64], sizes = [2, 32], strides = [1, 1]} : vector<2x96xf32> to vector<2x32xf32>
    %434 = arith.mulf %432, %416 : vector<2x32xf32>
    %435 = arith.mulf %431, %430 : vector<2x32xf32>
    %436 = arith.addf %434, %435 : vector<2x32xf32>
    %437 = math.tanh %436 : vector<2x32xf32>
    %438 = arith.mulf %433, %437 : vector<2x32xf32>
    %c0_215 = arith.constant 0 : index
    %c0_216 = arith.constant 0 : index
    %c0_217 = arith.constant 0 : index
    %439 = vector.load %arg5[%c0_215, %c0_216, %c0_217] : memref<2x2x32xf32, #tpu.memory_space<vmem>>, vector<1x2x32xf32>
    %440 = vector.shape_cast %439 : vector<1x2x32xf32> to vector<2x32xf32>
    %441 = vector.shape_cast %438 : vector<2x32xf32> to vector<1x2x32xf32>
    tpu.vector_store %arg5[%c0_215, %c0_216, %c0_217], %441 {strides = array<i32>} : memref<2x2x32xf32, #tpu.memory_space<vmem>>, vector<1x2x32xf32>,
    %c0_218 = arith.constant 0 : index
    %c0_219 = arith.constant 0 : index
    %c0_220 = arith.constant 0 : index
    %442 = vector.load %arg6[%c0_218, %c0_219, %c0_220] : memref<2x2x32xf32, #tpu.memory_space<vmem>>, vector<1x2x32xf32>
    %443 = vector.shape_cast %442 : vector<1x2x32xf32> to vector<2x32xf32>
    %444 = vector.shape_cast %436 : vector<2x32xf32> to vector<1x2x32xf32>
    tpu.vector_store %arg6[%c0_218, %c0_219, %c0_220], %444 {strides = array<i32>} : memref<2x2x32xf32, #tpu.memory_space<vmem>>, vector<1x2x32xf32>,
    %c1_221 = arith.constant 1 : index
    %c0_222 = arith.constant 0 : index
    %c0_223 = arith.constant 0 : index
    %445 = vector.load %arg5[%c1_221, %c0_222, %c0_223] : memref<2x2x32xf32, #tpu.memory_space<vmem>>, vector<1x2x32xf32>
    %446 = vector.shape_cast %445 : vector<1x2x32xf32> to vector<2x32xf32>
    %c1_224 = arith.constant 1 : index
    %c0_225 = arith.constant 0 : index
    %c0_226 = arith.constant 0 : index
    %447 = vector.load %arg6[%c1_224, %c0_225, %c0_226] : memref<2x2x32xf32, #tpu.memory_space<vmem>>, vector<1x2x32xf32>
    %448 = vector.shape_cast %447 : vector<1x2x32xf32> to vector<2x32xf32>
    %449 = tpu.concatenate %438, %446 in 1 : vector<2x32xf32>, vector<2x32xf32> -> vector<2x64xf32>
    %cst_227 = arith.constant dense<0.000000e+00> : vector<2x128xf32>
    %450 = tpu.matmul %449, %12, %cst_227 {dimension_numbers = #tpu.dot_dimension_numbers<[1], [0], [0], [1], [0, 0, 1, 1], [], []>} : vector<2x64xf32>, vector<64x128xf32>, vector<2x128xf32> -> vector<2x128xf32>
    %451 = vector.broadcast %16 : vector<1x128xf32> to vector<2x128xf32>
    %452 = arith.addf %450, %451 : vector<2x128xf32>
    %453 = vector.extract_strided_slice %452 {offsets = [0, 0], sizes = [2, 96], strides = [1, 1]} : vector<2x128xf32> to vector<2x96xf32>
    %454 = arith.negf %453 : vector<2x96xf32>
    %455 = math.exp %454 : vector<2x96xf32>
    %cst_228 = arith.constant 1.000000e+00 : f32
    %456 = vector.broadcast %cst_228 : f32 to vector<2x96xf32>
    %457 = arith.addf %456, %455 : vector<2x96xf32>
    %458 = arith.divf %456, %457 : vector<2x96xf32>
    %459 = vector.extract_strided_slice %452 {offsets = [0, 96], sizes = [2, 32], strides = [1, 1]} : vector<2x128xf32> to vector<2x32xf32>
    %460 = math.tanh %459 : vector<2x32xf32>
    %461 = vector.extract_strided_slice %458 {offsets = [0, 0], sizes = [2, 32], strides = [1, 1]} : vector<2x96xf32> to vector<2x32xf32>
    %462 = vector.extract_strided_slice %458 {offsets = [0, 32], sizes = [2, 32], strides = [1, 1]} : vector<2x96xf32> to vector<2x32xf32>
    %463 = vector.extract_strided_slice %458 {offsets = [0, 64], sizes = [2, 32], strides = [1, 1]} : vector<2x96xf32> to vector<2x32xf32>
    %464 = arith.mulf %462, %448 : vector<2x32xf32>
    %465 = arith.mulf %461, %460 : vector<2x32xf32>
    %466 = arith.addf %464, %465 : vector<2x32xf32>
    %467 = math.tanh %466 : vector<2x32xf32>
    %468 = arith.mulf %463, %467 : vector<2x32xf32>
    %c1_229 = arith.constant 1 : index
    %c0_230 = arith.constant 0 : index
    %c0_231 = arith.constant 0 : index
    %469 = vector.load %arg5[%c1_229, %c0_230, %c0_231] : memref<2x2x32xf32, #tpu.memory_space<vmem>>, vector<1x2x32xf32>
    %470 = vector.shape_cast %469 : vector<1x2x32xf32> to vector<2x32xf32>
    %471 = vector.shape_cast %468 : vector<2x32xf32> to vector<1x2x32xf32>
    tpu.vector_store %arg5[%c1_229, %c0_230, %c0_231], %471 {strides = array<i32>} : memref<2x2x32xf32, #tpu.memory_space<vmem>>, vector<1x2x32xf32>,
    %c1_232 = arith.constant 1 : index
    %c0_233 = arith.constant 0 : index
    %c0_234 = arith.constant 0 : index
    %472 = vector.load %arg6[%c1_232, %c0_233, %c0_234] : memref<2x2x32xf32, #tpu.memory_space<vmem>>, vector<1x2x32xf32>
    %473 = vector.shape_cast %472 : vector<1x2x32xf32> to vector<2x32xf32>
    %474 = vector.shape_cast %466 : vector<2x32xf32> to vector<1x2x32xf32>
    tpu.vector_store %arg6[%c1_232, %c0_233, %c0_234], %474 {strides = array<i32>} : memref<2x2x32xf32, #tpu.memory_space<vmem>>, vector<1x2x32xf32>,
    %c6 = arith.constant 6 : index
    %c0_235 = arith.constant 0 : index
    %c0_236 = arith.constant 0 : index
    %475 = vector.load %arg4[%c6, %c0_235, %c0_236] : memref<8x2x32xf32, #tpu.memory_space<vmem>>, vector<1x2x32xf32>
    %476 = vector.shape_cast %475 : vector<1x2x32xf32> to vector<2x32xf32>
    %477 = vector.shape_cast %468 : vector<2x32xf32> to vector<1x2x32xf32>
    tpu.vector_store %arg4[%c6, %c0_235, %c0_236], %477 {strides = array<i32>} : memref<8x2x32xf32, #tpu.memory_space<vmem>>, vector<1x2x32xf32>,
    %c0_237 = arith.constant 0 : index
    %c0_238 = arith.constant 0 : index
    %c0_239 = arith.constant 0 : index
    %478 = vector.load %arg5[%c0_237, %c0_238, %c0_239] : memref<2x2x32xf32, #tpu.memory_space<vmem>>, vector<1x2x32xf32>
    %479 = vector.shape_cast %478 : vector<1x2x32xf32> to vector<2x32xf32>
    %c0_240 = arith.constant 0 : index
    %c0_241 = arith.constant 0 : index
    %c0_242 = arith.constant 0 : index
    %480 = vector.load %arg6[%c0_240, %c0_241, %c0_242] : memref<2x2x32xf32, #tpu.memory_space<vmem>>, vector<1x2x32xf32>
    %481 = vector.shape_cast %480 : vector<1x2x32xf32> to vector<2x32xf32>
    %482 = vector.extract_strided_slice %18 {offsets = [14, 0], sizes = [2, 128], strides = [1, 1]} : vector<16x128xf32> to vector<2x128xf32>
    %483 = vector.extract_strided_slice %10 {offsets = [32, 0], sizes = [32, 128], strides = [1, 1]} : vector<64x128xf32> to vector<32x128xf32>
    %cst_243 = arith.constant dense<0.000000e+00> : vector<2x128xf32>
    %484 = tpu.matmul %479, %483, %cst_243 {dimension_numbers = #tpu.dot_dimension_numbers<[1], [0], [0], [1], [0, 0, 1, 1], [], []>} : vector<2x32xf32>, vector<32x128xf32>, vector<2x128xf32> -> vector<2x128xf32>
    %485 = arith.addf %482, %484 : vector<2x128xf32>
    %486 = vector.broadcast %14 : vector<1x128xf32> to vector<2x128xf32>
    %487 = arith.addf %485, %486 : vector<2x128xf32>
    %488 = vector.extract_strided_slice %487 {offsets = [0, 0], sizes = [2, 96], strides = [1, 1]} : vector<2x128xf32> to vector<2x96xf32>
    %489 = arith.negf %488 : vector<2x96xf32>
    %490 = math.exp %489 : vector<2x96xf32>
    %cst_244 = arith.constant 1.000000e+00 : f32
    %491 = vector.broadcast %cst_244 : f32 to vector<2x96xf32>
    %492 = arith.addf %491, %490 : vector<2x96xf32>
    %493 = arith.divf %491, %492 : vector<2x96xf32>
    %494 = vector.extract_strided_slice %487 {offsets = [0, 96], sizes = [2, 32], strides = [1, 1]} : vector<2x128xf32> to vector<2x32xf32>
    %495 = math.tanh %494 : vector<2x32xf32>
    %496 = vector.extract_strided_slice %493 {offsets = [0, 0], sizes = [2, 32], strides = [1, 1]} : vector<2x96xf32> to vector<2x32xf32>
    %497 = vector.extract_strided_slice %493 {offsets = [0, 32], sizes = [2, 32], strides = [1, 1]} : vector<2x96xf32> to vector<2x32xf32>
    %498 = vector.extract_strided_slice %493 {offsets = [0, 64], sizes = [2, 32], strides = [1, 1]} : vector<2x96xf32> to vector<2x32xf32>
    %499 = arith.mulf %497, %481 : vector<2x32xf32>
    %500 = arith.mulf %496, %495 : vector<2x32xf32>
    %501 = arith.addf %499, %500 : vector<2x32xf32>
    %502 = math.tanh %501 : vector<2x32xf32>
    %503 = arith.mulf %498, %502 : vector<2x32xf32>
    %c0_245 = arith.constant 0 : index
    %c0_246 = arith.constant 0 : index
    %c0_247 = arith.constant 0 : index
    %504 = vector.load %arg5[%c0_245, %c0_246, %c0_247] : memref<2x2x32xf32, #tpu.memory_space<vmem>>, vector<1x2x32xf32>
    %505 = vector.shape_cast %504 : vector<1x2x32xf32> to vector<2x32xf32>
    %506 = vector.shape_cast %503 : vector<2x32xf32> to vector<1x2x32xf32>
    tpu.vector_store %arg5[%c0_245, %c0_246, %c0_247], %506 {strides = array<i32>} : memref<2x2x32xf32, #tpu.memory_space<vmem>>, vector<1x2x32xf32>,
    %c0_248 = arith.constant 0 : index
    %c0_249 = arith.constant 0 : index
    %c0_250 = arith.constant 0 : index
    %507 = vector.load %arg6[%c0_248, %c0_249, %c0_250] : memref<2x2x32xf32, #tpu.memory_space<vmem>>, vector<1x2x32xf32>
    %508 = vector.shape_cast %507 : vector<1x2x32xf32> to vector<2x32xf32>
    %509 = vector.shape_cast %501 : vector<2x32xf32> to vector<1x2x32xf32>
    tpu.vector_store %arg6[%c0_248, %c0_249, %c0_250], %509 {strides = array<i32>} : memref<2x2x32xf32, #tpu.memory_space<vmem>>, vector<1x2x32xf32>,
    %c1_251 = arith.constant 1 : index
    %c0_252 = arith.constant 0 : index
    %c0_253 = arith.constant 0 : index
    %510 = vector.load %arg5[%c1_251, %c0_252, %c0_253] : memref<2x2x32xf32, #tpu.memory_space<vmem>>, vector<1x2x32xf32>
    %511 = vector.shape_cast %510 : vector<1x2x32xf32> to vector<2x32xf32>
    %c1_254 = arith.constant 1 : index
    %c0_255 = arith.constant 0 : index
    %c0_256 = arith.constant 0 : index
    %512 = vector.load %arg6[%c1_254, %c0_255, %c0_256] : memref<2x2x32xf32, #tpu.memory_space<vmem>>, vector<1x2x32xf32>
    %513 = vector.shape_cast %512 : vector<1x2x32xf32> to vector<2x32xf32>
    %514 = tpu.concatenate %503, %511 in 1 : vector<2x32xf32>, vector<2x32xf32> -> vector<2x64xf32>
    %cst_257 = arith.constant dense<0.000000e+00> : vector<2x128xf32>
    %515 = tpu.matmul %514, %12, %cst_257 {dimension_numbers = #tpu.dot_dimension_numbers<[1], [0], [0], [1], [0, 0, 1, 1], [], []>} : vector<2x64xf32>, vector<64x128xf32>, vector<2x128xf32> -> vector<2x128xf32>
    %516 = vector.broadcast %16 : vector<1x128xf32> to vector<2x128xf32>
    %517 = arith.addf %515, %516 : vector<2x128xf32>
    %518 = vector.extract_strided_slice %517 {offsets = [0, 0], sizes = [2, 96], strides = [1, 1]} : vector<2x128xf32> to vector<2x96xf32>
    %519 = arith.negf %518 : vector<2x96xf32>
    %520 = math.exp %519 : vector<2x96xf32>
    %cst_258 = arith.constant 1.000000e+00 : f32
    %521 = vector.broadcast %cst_258 : f32 to vector<2x96xf32>
    %522 = arith.addf %521, %520 : vector<2x96xf32>
    %523 = arith.divf %521, %522 : vector<2x96xf32>
    %524 = vector.extract_strided_slice %517 {offsets = [0, 96], sizes = [2, 32], strides = [1, 1]} : vector<2x128xf32> to vector<2x32xf32>
    %525 = math.tanh %524 : vector<2x32xf32>
    %526 = vector.extract_strided_slice %523 {offsets = [0, 0], sizes = [2, 32], strides = [1, 1]} : vector<2x96xf32> to vector<2x32xf32>
    %527 = vector.extract_strided_slice %523 {offsets = [0, 32], sizes = [2, 32], strides = [1, 1]} : vector<2x96xf32> to vector<2x32xf32>
    %528 = vector.extract_strided_slice %523 {offsets = [0, 64], sizes = [2, 32], strides = [1, 1]} : vector<2x96xf32> to vector<2x32xf32>
    %529 = arith.mulf %527, %513 : vector<2x32xf32>
    %530 = arith.mulf %526, %525 : vector<2x32xf32>
    %531 = arith.addf %529, %530 : vector<2x32xf32>
    %532 = math.tanh %531 : vector<2x32xf32>
    %533 = arith.mulf %528, %532 : vector<2x32xf32>
    %c1_259 = arith.constant 1 : index
    %c0_260 = arith.constant 0 : index
    %c0_261 = arith.constant 0 : index
    %534 = vector.load %arg5[%c1_259, %c0_260, %c0_261] : memref<2x2x32xf32, #tpu.memory_space<vmem>>, vector<1x2x32xf32>
    %535 = vector.shape_cast %534 : vector<1x2x32xf32> to vector<2x32xf32>
    %536 = vector.shape_cast %533 : vector<2x32xf32> to vector<1x2x32xf32>
    tpu.vector_store %arg5[%c1_259, %c0_260, %c0_261], %536 {strides = array<i32>} : memref<2x2x32xf32, #tpu.memory_space<vmem>>, vector<1x2x32xf32>,
    %c1_262 = arith.constant 1 : index
    %c0_263 = arith.constant 0 : index
    %c0_264 = arith.constant 0 : index
    %537 = vector.load %arg6[%c1_262, %c0_263, %c0_264] : memref<2x2x32xf32, #tpu.memory_space<vmem>>, vector<1x2x32xf32>
    %538 = vector.shape_cast %537 : vector<1x2x32xf32> to vector<2x32xf32>
    %539 = vector.shape_cast %531 : vector<2x32xf32> to vector<1x2x32xf32>
    tpu.vector_store %arg6[%c1_262, %c0_263, %c0_264], %539 {strides = array<i32>} : memref<2x2x32xf32, #tpu.memory_space<vmem>>, vector<1x2x32xf32>,
    %c7 = arith.constant 7 : index
    %c0_265 = arith.constant 0 : index
    %c0_266 = arith.constant 0 : index
    %540 = vector.load %arg4[%c7, %c0_265, %c0_266] : memref<8x2x32xf32, #tpu.memory_space<vmem>>, vector<1x2x32xf32>
    %541 = vector.shape_cast %540 : vector<1x2x32xf32> to vector<2x32xf32>
    %542 = vector.shape_cast %533 : vector<2x32xf32> to vector<1x2x32xf32>
    tpu.vector_store %arg4[%c7, %c0_265, %c0_266], %542 {strides = array<i32>} : memref<8x2x32xf32, #tpu.memory_space<vmem>>, vector<1x2x32xf32>,
    return
  }
}

</mosaic_0001>

<bundles_post_ra>
// kernel: tpu_custom_call.1
= control target key start
LH: loop header
LB: loop body
LE: loop exit
PB: predicated region body
PF: predicated region fallthrough
CT: control target
= control target key end

     0   :  { %12 = vsyncpa [#allocation3], 0  ;;  %s3536_s0 = inlined_call_operand.vmem [shape: s32[16,1], index: 0, kind: input, shape index: {}]   ;;  %s3537_s1 = inlined_call_operand.vmem [shape: f32[16,32], index: 1, kind: input, shape index: {}]   ;;  %s3538_s2 = inlined_call_operand.hbm [shape: f32[2,64,128], index: 2, kind: input, shape index: {}]   ;;  %s3539_s3 = inlined_call_operand.vmem [shape: f32[2,1,128], index: 3, kind: input, shape index: {}]   ;;  %s3540_s4 = inlined_call_operand.hbm [shape: f32[8,2,32], index: 4, kind: output, shape index: {0}]   ;;  %s3541_s5 = inlined_call_operand.hbm [shape: f32[2,2,32], index: 5, kind: output, shape index: {1}]   ;;  %s3542_s6 = inlined_call_operand.hbm [shape: f32[2,2,32], index: 6, kind: output, shape index: {2}]  }
   0x1   :  { %13 = vsyncpa [#allocation4], 0 }
   0x2   :  { %14 = vsyncpa [#allocation7], 0  ;;  %s3036_s21 = smov [#allocation2]   ;;  %s2942_s25 = scalar_lea.hbm %s3538_s2, 2048 }
   0x3   :  { %s24_s22 = sshll.u32 %s3036_s21, 4  ;;  %p2943_p0 = scmp.ne.s32.totalorder %s3538_s2, %s2942_s25  ;;  %s25_s22 = int_to_ptr.vmem [resolvable:$true] %s24_s22 }
   0x4   :  { %p2946_p1 = scmp.lt.u32.totalorder %s2942_s25, %s3538_s2 }
   0x6   :  { %p2948_p2 = pnand %p2946_p1, %p2943_p0 }
   0x8   :  { %2951 = shalt.err (!%p2948_p2)
}
   0x9   :  { %s2952_s30 = scalar_lea.vmem %s25_s22, 2048  ;;  %p2957_p4 = scmp.lt.s32.totalorder %s25_s22, %s25_s22 }
   0xa   :  { %p2953_p3 = scmp.ne.s32.totalorder %s25_s22, %s2952_s30  ;;  %p2958_p5 = scmp.lt.s32.totalorder %s2952_s30, %s2952_s30 }
   0xc   :  { %p2959_p6 = por %p2958_p5, %p2957_p4 }
   0xe   :  { %p2960_p7 = pnand %p2959_p6, %p2953_p3 }
  0x10   :  { %2963 = shalt.err (!%p2960_p7)
}
  0x11   :  { %s3037_s7 = smov 128   ;;  %s3038_s8 = smov 8  }
  0x12   :  { %30 = dma.hbm_to_vmem [thread:$0]  %s3538_s2, 2048, %s25_s22, [#allocation3], %s3037_s7, %s3037_s7, %s3038_s8  }
  0x13   :  { %3030 = dma.done.wait [#allocation3], 2048  }
  0x14   :  { %3031 = vsyncadd [#allocation3], 4294965248  ;;  %v3039_v0 = vmov 0   ;;  %v36_v1 = vld [vmem:[%s3536_s0] sm:$0xff]  ;;  %v51_v3 = vld [vmem:[%s3537_s1 + $0x8] sm:$0xff]  ;;  %v3040_v9 = vmov 0.0|0.0   ;;  %v38_v13 = vlaneseq }
  0x15   :  { %2811 = vset.pattern.permute.xlu0 %v3039_v0  ;;  %v50_v2 = vld [vmem:[%s3537_s1] sm:$0xff]  ;;  %v37_v4 = vld [vmem:[%s3536_s0 + $0x8] sm:$0xff]  ;;  %v135_v7 = vld [vmem:[#allocation2 + $0x8] sm:$0xff]  ;;  %2653 = vmatprep.subr.bf16.mxu0 %v3040_v9  ;;  %vm52_vm0 = vcmask 130048   ;;  %v3041_v16 = vmov 0.0   ;;  %vm236_vm3 = vcmask 254976  }
  0x16   :  { %41 = vperm.xlu0 %2811, %v36_v1   ;;  %v2641_v5 = vpack.c.bf16 %v51_v3, %v50_v2  ;;  %v134_v6 = vld [vmem:[#allocation2] sm:$0xff]  ;;  %v139_v11 = vld [vmem:[#allocation2 + $0x28] sm:$0xff]  ;;  %v39_v14 = vand.u32 127, %v38_v13  ;;  %v136_v18 = vld [vmem:[#allocation2 + $0x10] sm:$0xff]  ;;  %237 = vst.msk [vmem:[#allocation6] sm:$0x3] %vm236_vm3, %v3041_v16 }
  0x17   :  { %v2645_v8 = vpack.c.bf16 %v135_v7, %v134_v6  ;;  %v138_v10 = vld [vmem:[#allocation2 + $0x20] sm:$0xff]  ;;  %v137_v19 = vld [vmem:[#allocation2 + $0x18] sm:$0xff]  ;;  %238 = vst.msk [vmem:[#allocation6 + $0x2] sm:$0x3] %vm236_vm3, %v3041_v16  ;;  %239 = vst.msk [vmem:[#allocation8] sm:$0x3] %vm236_vm3, %v3041_v16 }
  0x18   :  { %2642 = vmatprep.subr.bf16.mxu1 %v2641_v5  ;;  %v3110_v12 = vpack.c.bf16 %v139_v11, %v138_v10  ;;  %v2649_v21 = vpack.c.bf16 %v137_v19, %v136_v18  ;;  %240 = vst.msk [vmem:[#allocation8 + $0x2] sm:$0x3] %vm236_vm3, %v3041_v16  ;;  %v140_v23 = vld [vmem:[#allocation2 + $0x30] sm:$0xff]  ;;  %v141_v24 = vld [vmem:[#allocation2 + $0x38] sm:$0xff]  ;;  %vm154_vm4 = vcmask 261120   ;;  %vm3042_vm5 = vmmov 0  }
  0x19   :  { %2644 = vmatpush3.bf16.msra.mxu1 %v2641_v5  ;;  %v3125_v25 = vpack.c.bf16 %v141_v24, %v140_v23  ;;  %2409 = vmatprep.mubr.msk.f32.mxu0 %vm3042_vm5, %v3041_v16  ;;  %v3147_v32 = vld [vmem:[%s3539_s3] ss:$0 sm:$0xff]  ;;  %s3043_s2 = smov 32   ;;  %v143_v48 = vld [vmem:[#allocation2 + $0x40] sm:$0xff]  ;;  %v144_v49 = vld [vmem:[#allocation2 + $0x48] sm:$0xff]  ;;  %s3044_s19 = smov 96  }
  0x1a   :  { %44 = vperm.xlu0 %2811, %v37_v4   ;;  %2646 = vmatprep.subr.bf16.mxu1 %v2645_v8  ;;  %v145_v50 = vld [vmem:[#allocation2 + $0x50] sm:$0xff]  ;;  %v3156_v51 = vpack.c.bf16 %v144_v49, %v143_v48  ;;  %v146_v52 = vld [vmem:[#allocation2 + $0x58] sm:$0xff]  ;;  %v147_v55 = vld [vmem:[#allocation2 + $0x60] sm:$0xff]  ;;  %s3045_s20 = smov 64   ;;  %vm377_vm6 = vcmask 523264   ;;  %vm603_vm7 = vcmask 257026  }
  0x1b   :  { %2655 = vmatpush3.bf16.msra.mxu0 %v3110_v12  ;;  %v3159_v53 = vpack.c.bf16 %v146_v52, %v145_v50  ;;  %v148_v56 = vld [vmem:[#allocation2 + $0x68] sm:$0xff]  ;;  %v149_v59 = vld [vmem:[#allocation2 + $0x70] sm:$0xff]  ;;  %v150_v60 = vld [vmem:[#allocation2 + $0x78] sm:$0xff]  ;;  %vm845_vm8 = vcmask 259076   ;;  %vm1087_vm9 = vcmask 261126   ;;  %s3047_s28 = smov [#allocation5]  }
  0x1c   :  { %2656 = vmatprep.subr.bf16.mxu0 %v3040_v9  ;;  %v3164_v58 = vpack.c.bf16 %v148_v56, %v147_v55  ;;  %v3169_v61 = vpack.c.bf16 %v150_v60, %v149_v59  ;;  %v3200_v5 = vld [vmem:[%s3539_s3 + $0x1] ss:$0 sm:$0xff]  ;;  %s2179_s29 = sshll.u32 %s3047_s28, 4  ;;  %s3048_s30 = smov [#allocation8]   ;;  %s3474_s29 = int_to_ptr.vmem [resolvable:$true] %s2179_s29 }
  0x1d   :  { %v241_v26 = vld [vmem:[#allocation6] sm:$0x3]  ;;  %s2203_s7 = sshll.u32 %s3048_s30, 4  ;;  %s3478_s7 = int_to_ptr.vmem [resolvable:$true] %s2203_s7 }
  0x1e   :  { %v242_v37 = vld [vmem:[#allocation8] sm:$0x3]  ;;  %v363_v57 = vld [vmem:[#allocation6 + $0x2] sm:$0x3] }
  0x1f   :  { %2658 = vmatpush3.bf16.msra.mxu0 %v3125_v25  ;;  %v365_v18 = vld [vmem:[#allocation8 + $0x2] sm:$0x3] }
  0x20   :  { %2671 = vmatprep.subr.bf16.mxu0 %v3040_v9 }
  0x22   :  { %2410 = vmatmul.mubr.msk.f32.vlgmr.msra.gmra.mrb[0].mxu0 %vm154_vm4, %v241_v26 }
  0x23   :  { %2673 = vmatpush3.bf16.msra.mxu0 %v3110_v12  ;;  %2439 = vmatprep.mubr.msk.f32.mxu0 %vm3042_vm5, %v3041_v16 }
  0x24   :  { %2674 = vmatprep.subr.bf16.mxu0 %v3040_v9 }
  0x27   :  { %2676 = vmatpush3.bf16.msra.mxu0 %v3125_v25 }
  0x28   :  { %2677 = vmatprep.subr.bf16.mxu0 %v3040_v9 }
  0x95   :  { %v42_v15 = vpop.permute.xlu0 %41 }
  0x96   :  { %vm46_vm1 = vcmp.eq.s32.totalorder %v42_v15, %v39_v14 }
  0x97   :  { %v48_v17 = vsel %vm46_vm1, 1.0, %v3041_v16 }
  0x98   :  { %2387 = vmatprep.mubr.msk.f32.mxu1 %vm52_vm0, %v48_v17 }
  0x99   :  { %v45_v20 = vpop.permute.xlu0 %44 }
  0x9a   :  { %vm47_vm2 = vcmp.eq.s32.totalorder %v45_v20, %v39_v14 }
  0x9b   :  { %v49_v22 = vsel %vm47_vm2, 1.0, %v3041_v16 }
  0x9c   :  { %2388 = vmatmul.mubr.msk.f32.vlgmr.msra.gmra.mrb[0].mxu1 %vm52_vm0, %v49_v22 }
  0x9d   :  { %2648 = vmatpush3.bf16.msra.mxu1 %v2645_v8 }
  0x9e   :  { %2650 = vmatprep.subr.bf16.mxu1 %v2649_v21 }
  0xa1   :  { %2652 = vmatpush3.bf16.msra.mxu1 %v2649_v21 }
  0xa2   :  { %2659 = vmatprep.subr.bf16.mxu1 %v3040_v9 }
  0xf5   :  { %v312_v29 = vpop.f32.mrb[0].mxu0 }
  0xf6   :  { %v2411_v30 = vpop.f32.mrb[1].mxu0 }
 0x16f   :  { %v2389_v27 = vpop.f32.mrb[0].mxu1 }
 0x170   :  { %v125_v28 = vpop.f32.mrb[1].mxu1 }
 0x171   :  { %2398 = vmatprep.mubr.msk.f32.mxu1 %vm154_vm4, %v125_v28 }
 0x172   :  { %2399 = vmatmul.mubr.msk.f32.vlgmr.msra.gmra.mrb[2].mxu1 %vm154_vm4, %v2389_v27 }
 0x173   :  { %2428 = vmatprep.mubr.msk.f32.mxu1 %vm3042_vm5, %v3041_v16  ;;  %2661 = vmatpush3.bf16.msra.mxu1 %v3156_v51 }
 0x174   :  { %2662 = vmatprep.subr.bf16.mxu1 %v3040_v9 }
 0x177   :  { %2664 = vmatpush3.bf16.msra.mxu1 %v3159_v53 }
 0x178   :  { %2665 = vmatprep.subr.bf16.mxu1 %v3040_v9 }
 0x17b   :  { %2667 = vmatpush3.bf16.msra.mxu1 %v3164_v58 }
 0x17c   :  { %2668 = vmatprep.subr.bf16.mxu1 %v3040_v9 }
 0x17f   :  { %2670 = vmatpush3.bf16.msra.mxu1 %v3169_v61 }
 0x180   :  { %2689 = vmatprep.subr.bf16.mxu1 %v3040_v9 }
 0x245   :  { %v3142_v31 = vpop.f32.mrb[2].mxu1 }
 0x246   :  { %v3149_v33 = vpop.f32.mrb[3].mxu1 }
 0x247   :  { %v316_v34 = vadd.f32 %v312_v29, %v3149_v33 }
 0x249   :  { %v323_v35 = vadd.f32 %v3147_v32, %v316_v34 }
 0x24b   :  { %2812 = vtanh.f32 %v323_v35  ;;  %v2229_v38 = vmul.f32 -1.442695, %v323_v35 }
 0x24d   :  { %2814 = vpow2.f32 %v2229_v38 }
 0x255   :  { %v2813_v36 = vpop.eup %2812 }
 0x256   :  { %337 = vrot.lane.b32.xlu1 %v2813_v36, %s3043_s2 }
 0x257   :  { %v2815_v39 = vpop.eup %2814 }
 0x258   :  { %v327_v40 = vadd.f32 1.0, %v2815_v39 }
 0x25a   :  { %332 = vrot.lane.b32.xlu1 %v242_v37, %s3043_s2  ;;  %2816 = vrcp.f32 %v327_v40 }
 0x264   :  { %v2817_v41 = vpop.eup %2816 }
 0x2c8   :  { %v338_v42 = vpop.permute.xlu1 %337 }
 0x2c9   :  { %v340_v43 = vmul.f32 %v2817_v41, %v338_v42 }
 0x2cb   :  { %342 = vrot.lane.b32.xlu0 %v340_v43, %s3043_s2 }
 0x2cc   :  { %v333_v44 = vpop.permute.xlu1 %332 }
 0x2cd   :  { %v335_v45 = vmul.f32 %v2817_v41, %v333_v44 }
 0x33d   :  { %v343_v46 = vpop.permute.xlu0 %342 }
 0x33e   :  { %v345_v47 = vadd.f32 %v343_v46, %v335_v45 }
 0x340   :  { %2818 = vtanh.f32 %v345_v47 }
 0x34a   :  { %v2819_v54 = vpop.eup %2818 }
 0x34b   :  { %348 = vrot.lane.b32.xlu1 %v2819_v54, %s3043_s2 }
 0x34f   :  { %367 = vrot.lane.b32.xlu1 %v363_v57, %s3043_s2 }
 0x353   :  { %358 = vrot.lane.b32.xlu1 %v345_v47, %s3044_s19 }
 0x3bd   :  { %v349_v62 = vpop.permute.xlu1 %348 }
 0x3be   :  { %v351_v63 = vmul.f32 %v2817_v41, %v349_v62 }
 0x3c0   :  { %353 = vrot.lane.b32.xlu0 %v351_v63, %s3045_s20 }
 0x3c1   :  { %v368_v0 = vpop.permute.xlu1 %367 }
 0x3c5   :  { %v359_v1 = vpop.permute.xlu1 %358 }
 0x3c6   :  { %361 = vst.msk [vmem:[#allocation8] sm:$0x3] %vm236_vm3, %v359_v1 }
 0x3cd   :  { %v491_v30 = vld [vmem:[#allocation8] sm:$0x3] }
 0x3ce   :  { %v578_v34 = vrot.slane %v491_v30, 6 }
 0x432   :  { %v354_v2 = vpop.permute.xlu0 %353 }
 0x433   :  { %356 = vst.msk [vmem:[#allocation6] sm:$0x3] %vm236_vm3, %v354_v2  ;;  %v370_v3 = vsel %vm154_vm4, %v354_v2, %v368_v0 }
 0x434   :  { %2429 = vmatmul.mubr.msk.f32.vlgmr.msra.gmra.mrb[4].mxu1 %vm377_vm6, %v370_v3 }
 0x435   :  { %2691 = vmatpush3.bf16.msra.mxu1 %v3110_v12  ;;  %2469 = vmatprep.mubr.msk.f32.mxu1 %vm3042_vm5, %v3041_v16 }
 0x436   :  { %2692 = vmatprep.subr.bf16.mxu1 %v3040_v9 }
 0x439   :  { %2694 = vmatpush3.bf16.msra.mxu1 %v3125_v25 }
 0x43a   :  { %v490_v4 = vld [vmem:[#allocation6] sm:$0x3]  ;;  %2695 = vmatprep.subr.bf16.mxu1 %v3040_v9 }
 0x43b   :  { %2440 = vmatmul.mubr.msk.f32.vlgmr.msra.gmra.mrb[2].mxu0 %vm154_vm4, %v490_v4 }
 0x43c   :  { %2679 = vmatpush3.bf16.msra.mxu0 %v3156_v51  ;;  %2458 = vmatprep.mubr.msk.f32.mxu0 %vm3042_vm5, %v3041_v16 }
 0x43d   :  { %2680 = vmatprep.subr.bf16.mxu0 %v3040_v9 }
 0x440   :  { %2682 = vmatpush3.bf16.msra.mxu0 %v3159_v53 }
 0x441   :  { %2683 = vmatprep.subr.bf16.mxu0 %v3040_v9 }
 0x444   :  { %2685 = vmatpush3.bf16.msra.mxu0 %v3164_v58 }
 0x445   :  { %2686 = vmatprep.subr.bf16.mxu0 %v3040_v9 }
 0x448   :  { %2688 = vmatpush3.bf16.msra.mxu0 %v3169_v61 }
 0x449   :  { %2707 = vmatprep.subr.bf16.mxu0 %v3040_v9 }
 0x507   :  { %v447_v6 = vpop.f32.mrb[4].mxu1 }
 0x508   :  { %v448_v7 = vadd.f32 %v3200_v5, %v447_v6  ;;  %v2430_v8 = vpop.f32.mrb[5].mxu1 }
 0x50a   :  { %2820 = vtanh.f32 %v448_v7  ;;  %v2232_v20 = vmul.f32 -1.442695, %v448_v7 }
 0x50e   :  { %v561_v10 = vpop.f32.mrb[2].mxu0 }
 0x50f   :  { %v566_v11 = vrot.slane %v561_v10, 6  ;;  %v2441_v13 = vpop.f32.mrb[3].mxu0 }
 0x511   :  { %v568_v14 = vadd.f32 %v566_v11, %v3149_v33 }
 0x513   :  { %v569_v15 = vadd.f32 %v3147_v32, %v568_v14 }
 0x514   :  { %v2821_v17 = vpop.eup %2820 }
 0x515   :  { %2822 = vtanh.f32 %v569_v15  ;;  %464 = vrot.lane.b32.xlu0 %v2821_v17, %s3043_s2  ;;  %v2234_v21 = vmul.f32 -1.442695, %v569_v15 }
 0x516   :  { %2824 = vpow2.f32 %v2232_v20 }
 0x517   :  { %2826 = vpow2.f32 %v2234_v21 }
 0x519   :  { %459 = vrot.lane.b32.xlu0 %v365_v18, %s3043_s2 }
 0x51f   :  { %v2823_v19 = vpop.eup %2822 }
 0x520   :  { %584 = vrot.lane.b32.xlu0 %v2823_v19, %s3043_s2  ;;  %v2825_v22 = vpop.eup %2824 }
 0x521   :  { %v454_v23 = vadd.f32 1.0, %v2825_v22  ;;  %v2827_v24 = vpop.eup %2826 }
 0x522   :  { %v573_v26 = vadd.f32 1.0, %v2827_v24 }
 0x523   :  { %2828 = vrcp.f32 %v454_v23 }
 0x524   :  { %2830 = vrcp.f32 %v573_v26 }
 0x52d   :  { %v2829_v27 = vpop.eup %2828 }
 0x52e   :  { %v2831_v36 = vpop.eup %2830 }
 0x587   :  { %v465_v28 = vpop.permute.xlu0 %464 }
 0x588   :  { %v467_v29 = vmul.f32 %v2829_v27, %v465_v28 }
 0x58a   :  { %469 = vrot.lane.b32.xlu1 %v467_v29, %s3043_s2 }
 0x58b   :  { %v460_v35 = vpop.permute.xlu0 %459 }
 0x58c   :  { %v462_v39 = vmul.f32 %v2829_v27, %v460_v35 }
 0x58e   :  { %579 = vrot.lane.b32.xlu1 %v578_v34, %s3043_s2 }
 0x592   :  { %v585_v37 = vpop.permute.xlu0 %584 }
 0x593   :  { %v587_v38 = vmul.f32 %v2831_v36, %v585_v37 }
 0x595   :  { %589 = vrot.lane.b32.xlu0 %v587_v38, %s3043_s2 }
 0x5fc   :  { %v470_v40 = vpop.permute.xlu1 %469 }
 0x5fd   :  { %v472_v41 = vadd.f32 %v470_v40, %v462_v39 }
 0x5ff   :  { %2832 = vtanh.f32 %v472_v41 }
 0x600   :  { %v580_v42 = vpop.permute.xlu1 %579 }
 0x601   :  { %v582_v43 = vmul.f32 %v2831_v36, %v580_v42 }
 0x607   :  { %v590_v44 = vpop.permute.xlu0 %589 }
 0x608   :  { %v592_v45 = vadd.f32 %v590_v44, %v582_v43 }
 0x609   :  { %v2833_v46 = vpop.eup %2832 }
 0x60a   :  { %2834 = vtanh.f32 %v592_v45  ;;  %475 = vrot.lane.b32.xlu1 %v2833_v46, %s3043_s2 }
 0x614   :  { %v2835_v47 = vpop.eup %2834 }
 0x615   :  { %595 = vrot.lane.b32.xlu1 %v2835_v47, %s3043_s2 }
 0x67c   :  { %v476_v48 = vpop.permute.xlu1 %475 }
 0x67d   :  { %v478_v49 = vmul.f32 %v2829_v27, %v476_v48 }
 0x67f   :  { %480 = vrot.lane.b32.xlu0 %v478_v49, %s3045_s20 }
 0x687   :  { %v596_v50 = vpop.permute.xlu1 %595 }
 0x688   :  { %v598_v52 = vmul.f32 %v2831_v36, %v596_v50 }
 0x68a   :  { %600 = vrot.lane.b32.xlu0 %v598_v52, %s3045_s20 }
 0x68e   :  { %485 = vrot.lane.b32.xlu0 %v472_v41, %s3044_s19 }
 0x692   :  { %606 = vrot.lane.b32.xlu0 %v592_v45, %s3044_s19 }
 0x6f1   :  { %v481_v54 = vpop.permute.xlu0 %480 }
 0x6f2   :  { %483 = vst.msk [vmem:[#allocation6 + $0x2] sm:$0x3] %vm236_vm3, %v481_v54  ;;  %489 = vst.msk [vmem:[#allocation5] sm:$0x3] %vm236_vm3, %v481_v54 }
 0x6f9   :  { %v610_v55 = vld [vmem:[#allocation6 + $0x2] sm:$0x3] }
 0x6fa   :  { %v613_v56 = vrot.slane %v610_v55, 6 }
 0x6fc   :  { %614 = vrot.lane.b32.xlu1 %v613_v56, %s3043_s2  ;;  %v601_v57 = vpop.permute.xlu0 %600 }
 0x6fd   :  { %604 = vst.msk [vmem:[#allocation6 - $0x2] sm:$0xc] %vm603_vm7, %v601_v57 }
 0x700   :  { %v486_v59 = vpop.permute.xlu0 %485 }
 0x701   :  { %488 = vst.msk [vmem:[#allocation8 + $0x2] sm:$0x3] %vm236_vm3, %v486_v59 }
 0x704   :  { %v607_v60 = vpop.permute.xlu0 %606  ;;  %v732_v62 = vld [vmem:[#allocation6] sm:$0x3] }
 0x705   :  { %609 = vst.msk [vmem:[#allocation8 - $0x2] sm:$0xc] %vm603_vm7, %v607_v60  ;;  %2470 = vmatmul.mubr.msk.f32.vlgmr.msra.gmra.mrb[6].mxu1 %vm154_vm4, %v732_v62 }
 0x706   :  { %2697 = vmatpush3.bf16.msra.mxu1 %v3156_v51  ;;  %2488 = vmatprep.mubr.msk.f32.mxu1 %vm3042_vm5, %v3041_v16 }
 0x707   :  { %2698 = vmatprep.subr.bf16.mxu1 %v3040_v9 }
 0x708   :  { %v611_v14 = vld [vmem:[#allocation8 + $0x2] sm:$0x3] }
 0x70a   :  { %2700 = vmatpush3.bf16.msra.mxu1 %v3159_v53 }
 0x70b   :  { %2701 = vmatprep.subr.bf16.mxu1 %v3040_v9 }
 0x70c   :  { %v733_v27 = vld [vmem:[#allocation8] sm:$0x3] }
 0x70d   :  { %v820_v29 = vrot.slane %v733_v27, 4 }
 0x70e   :  { %2703 = vmatpush3.bf16.msra.mxu1 %v3164_v58 }
 0x70f   :  { %2704 = vmatprep.subr.bf16.mxu1 %v3040_v9 }
 0x712   :  { %2706 = vmatpush3.bf16.msra.mxu1 %v3169_v61 }
 0x713   :  { %2725 = vmatprep.subr.bf16.mxu1 %v3040_v9 }
 0x76e   :  { %v615_v63 = vpop.permute.xlu1 %614 }
 0x76f   :  { %v617_v0 = vsel %vm154_vm4, %v601_v57, %v615_v63 }
 0x770   :  { %v619_v1 = vrot.slane %v617_v0, 2 }
 0x772   :  { %2459 = vmatmul.mubr.msk.f32.vlgmr.msra.gmra.mrb[4].mxu0 %vm377_vm6, %v619_v1 }
 0x773   :  { %2709 = vmatpush3.bf16.msra.mxu0 %v3110_v12  ;;  %2499 = vmatprep.mubr.msk.f32.mxu0 %vm3042_vm5, %v3041_v16 }
 0x774   :  { %2710 = vmatprep.subr.bf16.mxu0 %v3040_v9 }
 0x777   :  { %2712 = vmatpush3.bf16.msra.mxu0 %v3125_v25 }
 0x778   :  { %2713 = vmatprep.subr.bf16.mxu0 %v3040_v9 }
 0x7d8   :  { %v803_v2 = vpop.f32.mrb[6].mxu1 }
 0x7d9   :  { %v808_v3 = vrot.slane %v803_v2, 4  ;;  %v2471_v4 = vpop.f32.mrb[7].mxu1 }
 0x7db   :  { %v810_v6 = vadd.f32 %v808_v3, %v3149_v33 }
 0x7dd   :  { %v811_v11 = vadd.f32 %v3147_v32, %v810_v6 }
 0x7df   :  { %v2238_v18 = vmul.f32 -1.442695, %v811_v11 }
 0x845   :  { %v688_v7 = vpop.f32.mrb[4].mxu0 }
 0x846   :  { %v689_v8 = vadd.f32 %v3200_v5, %v688_v7  ;;  %v2460_v10 = vpop.f32.mrb[5].mxu0 }
 0x848   :  { %2836 = vtanh.f32 %v689_v8  ;;  %v2236_v17 = vmul.f32 -1.442695, %v689_v8 }
 0x849   :  { %2838 = vtanh.f32 %v811_v11 }
 0x84a   :  { %2840 = vpow2.f32 %v2236_v17 }
 0x84b   :  { %2842 = vpow2.f32 %v2238_v18 }
 0x852   :  { %v2837_v13 = vpop.eup %2836 }
 0x853   :  { %705 = vrot.lane.b32.xlu1 %v2837_v13, %s3043_s2  ;;  %v2839_v15 = vpop.eup %2838 }
 0x854   :  { %v2841_v19 = vpop.eup %2840 }
 0x855   :  { %v695_v20 = vadd.f32 1.0, %v2841_v19  ;;  %v2843_v21 = vpop.eup %2842 }
 0x856   :  { %v815_v22 = vadd.f32 1.0, %v2843_v21 }
 0x857   :  { %700 = vrot.lane.b32.xlu1 %v611_v14, %s3043_s2  ;;  %2844 = vrcp.f32 %v695_v20 }
 0x858   :  { %2846 = vrcp.f32 %v815_v22 }
 0x85b   :  { %826 = vrot.lane.b32.xlu1 %v2839_v15, %s3043_s2 }
 0x861   :  { %v2845_v23 = vpop.eup %2844 }
 0x862   :  { %v2847_v30 = vpop.eup %2846 }
 0x8c5   :  { %v706_v24 = vpop.permute.xlu1 %705 }
 0x8c6   :  { %v708_v26 = vmul.f32 %v2845_v23, %v706_v24 }
 0x8c8   :  { %710 = vrot.lane.b32.xlu0 %v708_v26, %s3043_s2 }
 0x8c9   :  { %v701_v28 = vpop.permute.xlu1 %700 }
 0x8ca   :  { %v703_v36 = vmul.f32 %v2845_v23, %v701_v28 }
 0x8cc   :  { %821 = vrot.lane.b32.xlu0 %v820_v29, %s3043_s2 }
 0x8cd   :  { %v827_v34 = vpop.permute.xlu1 %826 }
 0x8ce   :  { %v829_v35 = vmul.f32 %v2847_v30, %v827_v34 }
 0x8d0   :  { %831 = vrot.lane.b32.xlu1 %v829_v35, %s3043_s2 }
 0x93a   :  { %v711_v37 = vpop.permute.xlu0 %710 }
 0x93b   :  { %v713_v38 = vadd.f32 %v711_v37, %v703_v36 }
 0x93d   :  { %2848 = vtanh.f32 %v713_v38 }
 0x93e   :  { %v822_v39 = vpop.permute.xlu0 %821 }
 0x93f   :  { %v824_v40 = vmul.f32 %v2847_v30, %v822_v39 }
 0x942   :  { %v832_v41 = vpop.permute.xlu1 %831 }
 0x943   :  { %v834_v42 = vadd.f32 %v832_v41, %v824_v40 }
 0x945   :  { %2850 = vtanh.f32 %v834_v42 }
 0x947   :  { %v2849_v43 = vpop.eup %2848 }
 0x948   :  { %716 = vrot.lane.b32.xlu0 %v2849_v43, %s3043_s2 }
 0x94f   :  { %v2851_v44 = vpop.eup %2850 }
 0x950   :  { %837 = vrot.lane.b32.xlu0 %v2851_v44, %s3043_s2 }
 0x9ba   :  { %v717_v45 = vpop.permute.xlu0 %716 }
 0x9bb   :  { %v719_v46 = vmul.f32 %v2845_v23, %v717_v45 }
 0x9bd   :  { %721 = vrot.lane.b32.xlu1 %v719_v46, %s3045_s20 }
 0x9c2   :  { %v838_v47 = vpop.permute.xlu0 %837 }
 0x9c3   :  { %v840_v48 = vmul.f32 %v2847_v30, %v838_v47 }
 0x9c5   :  { %842 = vrot.lane.b32.xlu1 %v840_v48, %s3045_s20 }
 0x9c9   :  { %726 = vrot.lane.b32.xlu1 %v713_v38, %s3044_s19 }
 0x9cd   :  { %848 = vrot.lane.b32.xlu1 %v834_v42, %s3044_s19 }
 0xa2f   :  { %v722_v49 = vpop.permute.xlu1 %721 }
 0xa30   :  { %724 = vst.msk [vmem:[#allocation6 + $0x2] sm:$0x3] %vm236_vm3, %v722_v49  ;;  %731 = vst.msk [vmem:[#allocation5 + $0x2] sm:$0x3] %vm236_vm3, %v722_v49 }
 0xa37   :  { %v843_v50 = vpop.permute.xlu1 %842  ;;  %v852_v52 = vld [vmem:[#allocation6 + $0x2] sm:$0x3] }
 0xa38   :  { %846 = vst.msk [vmem:[#allocation6 - $0x4] sm:$0x30] %vm845_vm8, %v843_v50  ;;  %v855_v54 = vrot.slane %v852_v52, 4 }
 0xa3a   :  { %856 = vrot.lane.b32.xlu0 %v855_v54, %s3043_s2 }
 0xa3b   :  { %v727_v55 = vpop.permute.xlu1 %726 }
 0xa3c   :  { %729 = vst.msk [vmem:[#allocation8 + $0x2] sm:$0x3] %vm236_vm3, %v727_v55 }
 0xa3f   :  { %v849_v56 = vpop.permute.xlu1 %848  ;;  %v974_v57 = vld [vmem:[#allocation6] sm:$0x3] }
 0xa40   :  { %851 = vst.msk [vmem:[#allocation8 - $0x4] sm:$0x30] %vm845_vm8, %v849_v56  ;;  %2500 = vmatmul.mubr.msk.f32.vlgmr.msra.gmra.mrb[6].mxu0 %vm154_vm4, %v974_v57 }
 0xa41   :  { %2715 = vmatpush3.bf16.msra.mxu0 %v3156_v51  ;;  %2518 = vmatprep.mubr.msk.f32.mxu0 %vm3042_vm5, %v3041_v16 }
 0xa42   :  { %2716 = vmatprep.subr.bf16.mxu0 %v3040_v9 }
 0xa43   :  { %v853_v10 = vld [vmem:[#allocation8 + $0x2] sm:$0x3] }
 0xa45   :  { %2718 = vmatpush3.bf16.msra.mxu0 %v3159_v53 }
 0xa46   :  { %2719 = vmatprep.subr.bf16.mxu0 %v3040_v9 }
 0xa47   :  { %v975_v22 = vld [vmem:[#allocation8] sm:$0x3] }
 0xa48   :  { %v1062_v24 = vrot.slane %v975_v22, 2 }
 0xa49   :  { %2721 = vmatpush3.bf16.msra.mxu0 %v3164_v58 }
 0xa4a   :  { %2722 = vmatprep.subr.bf16.mxu0 %v3040_v9 }
 0xa4d   :  { %2724 = vmatpush3.bf16.msra.mxu0 %v3169_v61 }
 0xa4e   :  { %2743 = vmatprep.subr.bf16.mxu0 %v3040_v9 }
 0xaac   :  { %v857_v59 = vpop.permute.xlu0 %856 }
 0xaad   :  { %v859_v60 = vsel %vm154_vm4, %v843_v50, %v857_v59 }
 0xaae   :  { %v861_v62 = vrot.slane %v859_v60, 4 }
 0xab0   :  { %2489 = vmatmul.mubr.msk.f32.vlgmr.msra.gmra.mrb[8].mxu1 %vm377_vm6, %v861_v62 }
 0xab1   :  { %2727 = vmatpush3.bf16.msra.mxu1 %v3110_v12  ;;  %2529 = vmatprep.mubr.msk.f32.mxu1 %vm3042_vm5, %v3041_v16 }
 0xab2   :  { %2728 = vmatprep.subr.bf16.mxu1 %v3040_v9 }
 0xab5   :  { %2730 = vmatpush3.bf16.msra.mxu1 %v3125_v25 }
 0xab6   :  { %2731 = vmatprep.subr.bf16.mxu1 %v3040_v9 }
 0xb13   :  { %v1045_v63 = vpop.f32.mrb[6].mxu0 }
 0xb14   :  { %v1050_v0 = vrot.slane %v1045_v63, 2  ;;  %v2501_v1 = vpop.f32.mrb[7].mxu0 }
 0xb16   :  { %v1052_v2 = vadd.f32 %v1050_v0, %v3149_v33 }
 0xb18   :  { %v1053_v7 = vadd.f32 %v3147_v32, %v1052_v2 }
 0xb1a   :  { %v2242_v33 = vmul.f32 -1.442695, %v1053_v7 }
 0xb83   :  { %v930_v3 = vpop.f32.mrb[8].mxu1 }
 0xb84   :  { %v931_v4 = vadd.f32 %v3200_v5, %v930_v3  ;;  %v2490_v6 = vpop.f32.mrb[9].mxu1 }
 0xb86   :  { %2852 = vtanh.f32 %v931_v4  ;;  %v2240_v13 = vmul.f32 -1.442695, %v931_v4 }
 0xb87   :  { %2854 = vtanh.f32 %v1053_v7 }
 0xb88   :  { %2856 = vpow2.f32 %v2240_v13 }
 0xb89   :  { %2858 = vpow2.f32 %v2242_v33 }
 0xb90   :  { %v2853_v8 = vpop.eup %2852 }
 0xb91   :  { %947 = vrot.lane.b32.xlu0 %v2853_v8, %s3043_s2  ;;  %v2855_v11 = vpop.eup %2854 }
 0xb92   :  { %v2857_v14 = vpop.eup %2856 }
 0xb93   :  { %v937_v15 = vadd.f32 1.0, %v2857_v14  ;;  %v2859_v17 = vpop.eup %2858 }
 0xb94   :  { %v1057_v18 = vadd.f32 1.0, %v2859_v17 }
 0xb95   :  { %942 = vrot.lane.b32.xlu0 %v853_v10, %s3043_s2  ;;  %2860 = vrcp.f32 %v937_v15 }
 0xb96   :  { %2862 = vrcp.f32 %v1057_v18 }
 0xb99   :  { %1068 = vrot.lane.b32.xlu0 %v2855_v11, %s3043_s2 }
 0xb9f   :  { %v2861_v19 = vpop.eup %2860 }
 0xba0   :  { %v2863_v26 = vpop.eup %2862 }
 0xc03   :  { %v948_v20 = vpop.permute.xlu0 %947 }
 0xc04   :  { %v950_v21 = vmul.f32 %v2861_v19, %v948_v20 }
 0xc06   :  { %952 = vrot.lane.b32.xlu1 %v950_v21, %s3043_s2 }
 0xc07   :  { %v943_v23 = vpop.permute.xlu0 %942 }
 0xc08   :  { %v945_v29 = vmul.f32 %v2861_v19, %v943_v23 }
 0xc0a   :  { %1063 = vrot.lane.b32.xlu1 %v1062_v24, %s3043_s2 }
 0xc0b   :  { %v1069_v27 = vpop.permute.xlu0 %1068 }
 0xc0c   :  { %v1071_v28 = vmul.f32 %v2863_v26, %v1069_v27 }
 0xc0e   :  { %1073 = vrot.lane.b32.xlu0 %v1071_v28, %s3043_s2 }
 0xc78   :  { %v953_v30 = vpop.permute.xlu1 %952 }
 0xc79   :  { %v955_v34 = vadd.f32 %v953_v30, %v945_v29 }
 0xc7b   :  { %2864 = vtanh.f32 %v955_v34 }
 0xc7c   :  { %v1064_v35 = vpop.permute.xlu1 %1063 }
 0xc7d   :  { %v1066_v36 = vmul.f32 %v2863_v26, %v1064_v35 }
 0xc80   :  { %v1074_v37 = vpop.permute.xlu0 %1073 }
 0xc81   :  { %v1076_v38 = vadd.f32 %v1074_v37, %v1066_v36 }
 0xc83   :  { %2866 = vtanh.f32 %v1076_v38 }
 0xc85   :  { %v2865_v39 = vpop.eup %2864 }
 0xc86   :  { %958 = vrot.lane.b32.xlu1 %v2865_v39, %s3043_s2 }
 0xc8d   :  { %v2867_v40 = vpop.eup %2866 }
 0xc8e   :  { %1079 = vrot.lane.b32.xlu1 %v2867_v40, %s3043_s2 }
 0xcf8   :  { %v959_v41 = vpop.permute.xlu1 %958 }
 0xcf9   :  { %v961_v42 = vmul.f32 %v2861_v19, %v959_v41 }
 0xcfb   :  { %963 = vrot.lane.b32.xlu0 %v961_v42, %s3045_s20 }
 0xd00   :  { %v1080_v43 = vpop.permute.xlu1 %1079 }
 0xd01   :  { %v1082_v44 = vmul.f32 %v2863_v26, %v1080_v43 }
 0xd03   :  { %1084 = vrot.lane.b32.xlu0 %v1082_v44, %s3045_s20 }
 0xd07   :  { %968 = vrot.lane.b32.xlu0 %v955_v34, %s3044_s19 }
 0xd0b   :  { %1090 = vrot.lane.b32.xlu0 %v1076_v38, %s3044_s19 }
 0xd6d   :  { %v964_v45 = vpop.permute.xlu0 %963 }
 0xd6e   :  { %966 = vst.msk [vmem:[#allocation6 + $0x2] sm:$0x3] %vm236_vm3, %v964_v45  ;;  %973 = vst.msk [vmem:[#allocation5 + $0x4] sm:$0x3] %vm236_vm3, %v964_v45 }
 0xd75   :  { %v1085_v46 = vpop.permute.xlu0 %1084  ;;  %v1094_v47 = vld [vmem:[#allocation6 + $0x2] sm:$0x3] }
 0xd76   :  { %1088 = vst.msk [vmem:[#allocation6 - $0x6] sm:$0xc0] %vm1087_vm9, %v1085_v46  ;;  %v1097_v48 = vrot.slane %v1094_v47, 2 }
 0xd78   :  { %1098 = vrot.lane.b32.xlu1 %v1097_v48, %s3043_s2 }
 0xd79   :  { %v969_v49 = vpop.permute.xlu0 %968 }
 0xd7a   :  { %971 = vst.msk [vmem:[#allocation8 + $0x2] sm:$0x3] %vm236_vm3, %v969_v49 }
 0xd7d   :  { %v1091_v50 = vpop.permute.xlu0 %1090  ;;  %v1216_v52 = vld [vmem:[#allocation6] sm:$0x3] }
 0xd7e   :  { %1093 = vst.msk [vmem:[#allocation8 - $0x6] sm:$0xc0] %vm1087_vm9, %v1091_v50  ;;  %2530 = vmatmul.mubr.msk.f32.vlgmr.msra.gmra.mrb[10].mxu1 %vm154_vm4, %v1216_v52 }
 0xd7f   :  { %2733 = vmatpush3.bf16.msra.mxu1 %v3156_v51  ;;  %2548 = vmatprep.mubr.msk.f32.mxu1 %vm3042_vm5, %v3041_v16 }
 0xd80   :  { %2734 = vmatprep.subr.bf16.mxu1 %v3040_v9 }
 0xd81   :  { %v1095_v3 = vld [vmem:[#allocation8 + $0x2] sm:$0x3] }
 0xd83   :  { %2736 = vmatpush3.bf16.msra.mxu1 %v3159_v53 }
 0xd84   :  { %2737 = vmatprep.subr.bf16.mxu1 %v3040_v9 }
 0xd85   :  { %v1217_v18 = vld [vmem:[#allocation8] sm:$0x3] }
 0xd87   :  { %2739 = vmatpush3.bf16.msra.mxu1 %v3164_v58 }
 0xd88   :  { %2740 = vmatprep.subr.bf16.mxu1 %v3040_v9 }
 0xd8b   :  { %2742 = vmatpush3.bf16.msra.mxu1 %v3169_v61 }
 0xd8c   :  { %2761 = vmatprep.subr.bf16.mxu1 %v3040_v9 }
 0xdea   :  { %v1099_v54 = vpop.permute.xlu1 %1098 }
 0xdeb   :  { %v1101_v55 = vsel %vm154_vm4, %v1085_v46, %v1099_v54 }
 0xdec   :  { %v1103_v56 = vrot.slane %v1101_v55, 6 }
 0xdee   :  { %2519 = vmatmul.mubr.msk.f32.vlgmr.msra.gmra.mrb[8].mxu0 %vm377_vm6, %v1103_v56 }
 0xdef   :  { %2745 = vmatpush3.bf16.msra.mxu0 %v3110_v12  ;;  %2559 = vmatprep.mubr.msk.f32.mxu0 %vm3042_vm5, %v3041_v16 }
 0xdf0   :  { %2746 = vmatprep.subr.bf16.mxu0 %v3040_v9 }
 0xdf3   :  { %2748 = vmatpush3.bf16.msra.mxu0 %v3125_v25 }
 0xdf4   :  { %2749 = vmatprep.subr.bf16.mxu0 %v3040_v9 }
 0xe51   :  { %v1287_v57 = vpop.f32.mrb[10].mxu1 }
 0xe52   :  { %v1291_v59 = vadd.f32 %v3142_v31, %v1287_v57  ;;  %v2531_v60 = vpop.f32.mrb[11].mxu1 }
 0xe54   :  { %v1292_v1 = vadd.f32 %v3147_v32, %v1291_v59 }
 0xe56   :  { %v2246_v7 = vmul.f32 -1.442695, %v1292_v1 }
 0xec1   :  { %v1172_v62 = vpop.f32.mrb[8].mxu0 }
 0xec2   :  { %v1173_v63 = vadd.f32 %v3200_v5, %v1172_v62  ;;  %v2520_v0 = vpop.f32.mrb[9].mxu0 }
 0xec4   :  { %2868 = vtanh.f32 %v1173_v63  ;;  %v2244_v6 = vmul.f32 -1.442695, %v1173_v63 }
 0xec5   :  { %2870 = vtanh.f32 %v1292_v1 }
 0xec6   :  { %2872 = vpow2.f32 %v2244_v6 }
 0xec7   :  { %2874 = vpow2.f32 %v2246_v7 }
 0xece   :  { %v2869_v2 = vpop.eup %2868 }
 0xecf   :  { %1189 = vrot.lane.b32.xlu1 %v2869_v2, %s3043_s2  ;;  %v2871_v4 = vpop.eup %2870 }
 0xed0   :  { %v2873_v8 = vpop.eup %2872 }
 0xed1   :  { %v1179_v10 = vadd.f32 1.0, %v2873_v8  ;;  %v2875_v11 = vpop.eup %2874 }
 0xed2   :  { %v1296_v13 = vadd.f32 1.0, %v2875_v11 }
 0xed3   :  { %1184 = vrot.lane.b32.xlu1 %v1095_v3, %s3043_s2  ;;  %2876 = vrcp.f32 %v1179_v10 }
 0xed4   :  { %2878 = vrcp.f32 %v1296_v13 }
 0xed7   :  { %1306 = vrot.lane.b32.xlu1 %v2871_v4, %s3043_s2 }
 0xedd   :  { %v2877_v33 = vpop.eup %2876 }
 0xede   :  { %v2879_v19 = vpop.eup %2878 }
 0xf41   :  { %v1190_v14 = vpop.permute.xlu1 %1189 }
 0xf42   :  { %v1192_v15 = vmul.f32 %v2877_v33, %v1190_v14 }
 0xf44   :  { %1194 = vrot.lane.b32.xlu0 %v1192_v15, %s3043_s2 }
 0xf45   :  { %v1185_v17 = vpop.permute.xlu1 %1184 }
 0xf46   :  { %v1187_v22 = vmul.f32 %v2877_v33, %v1185_v17 }
 0xf48   :  { %1301 = vrot.lane.b32.xlu0 %v1217_v18, %s3043_s2 }
 0xf49   :  { %v1307_v20 = vpop.permute.xlu1 %1306 }
 0xf4a   :  { %v1309_v21 = vmul.f32 %v2879_v19, %v1307_v20 }
 0xf4c   :  { %1311 = vrot.lane.b32.xlu1 %v1309_v21, %s3043_s2 }
 0xfb6   :  { %v1195_v23 = vpop.permute.xlu0 %1194 }
 0xfb7   :  { %v1197_v24 = vadd.f32 %v1195_v23, %v1187_v22 }
 0xfb9   :  { %2880 = vtanh.f32 %v1197_v24 }
 0xfba   :  { %v1302_v26 = vpop.permute.xlu0 %1301 }
 0xfbb   :  { %v1304_v27 = vmul.f32 %v2879_v19, %v1302_v26 }
 0xfbe   :  { %v1312_v28 = vpop.permute.xlu1 %1311 }
 0xfbf   :  { %v1314_v29 = vadd.f32 %v1312_v28, %v1304_v27 }
 0xfc1   :  { %2882 = vtanh.f32 %v1314_v29 }
 0xfc3   :  { %v2881_v30 = vpop.eup %2880 }
 0xfc4   :  { %1200 = vrot.lane.b32.xlu0 %v2881_v30, %s3043_s2 }
 0xfcb   :  { %v2883_v34 = vpop.eup %2882 }
 0xfcc   :  { %1317 = vrot.lane.b32.xlu0 %v2883_v34, %s3043_s2 }
0x1036   :  { %v1201_v35 = vpop.permute.xlu0 %1200 }
0x1037   :  { %v1203_v36 = vmul.f32 %v2877_v33, %v1201_v35 }
0x1039   :  { %1205 = vrot.lane.b32.xlu1 %v1203_v36, %s3045_s20 }
0x103e   :  { %v1318_v37 = vpop.permute.xlu0 %1317 }
0x103f   :  { %v1320_v38 = vmul.f32 %v2879_v19, %v1318_v37 }
0x1041   :  { %1322 = vrot.lane.b32.xlu1 %v1320_v38, %s3045_s20 }
0x1045   :  { %1210 = vrot.lane.b32.xlu1 %v1197_v24, %s3044_s19 }
0x1049   :  { %1327 = vrot.lane.b32.xlu1 %v1314_v29, %s3044_s19 }
0x10ab   :  { %v1206_v39 = vpop.permute.xlu1 %1205 }
0x10ac   :  { %1208 = vst.msk [vmem:[#allocation6 + $0x2] sm:$0x3] %vm236_vm3, %v1206_v39  ;;  %1215 = vst.msk [vmem:[#allocation5 + $0x6] sm:$0x3] %vm236_vm3, %v1206_v39 }
0x10b3   :  { %v1323_v40 = vpop.permute.xlu1 %1322  ;;  %v1331_v41 = vld [vmem:[#allocation6 + $0x2] sm:$0x3] }
0x10b4   :  { %1325 = vst.msk [vmem:[#allocation6] sm:$0x3] %vm236_vm3, %v1323_v40  ;;  %1334 = vrot.lane.b32.xlu0 %v1331_v41, %s3043_s2 }
0x10b7   :  { %v1211_v42 = vpop.permute.xlu1 %1210 }
0x10b8   :  { %1213 = vst.msk [vmem:[#allocation8 + $0x2] sm:$0x3] %vm236_vm3, %v1211_v42 }
0x10bb   :  { %v1328_v43 = vpop.permute.xlu1 %1327  ;;  %v1451_v44 = vld [vmem:[#allocation6] sm:$0x3] }
0x10bc   :  { %1330 = vst.msk [vmem:[#allocation8] sm:$0x3] %vm236_vm3, %v1328_v43  ;;  %2560 = vmatmul.mubr.msk.f32.vlgmr.msra.gmra.mrb[10].mxu0 %vm154_vm4, %v1451_v44 }
0x10bd   :  { %2751 = vmatpush3.bf16.msra.mxu0 %v3156_v51  ;;  %2578 = vmatprep.mubr.msk.f32.mxu0 %vm3042_vm5, %v3041_v16 }
0x10be   :  { %2752 = vmatprep.subr.bf16.mxu0 %v3040_v9 }
0x10bf   :  { %v1332_v59 = vld [vmem:[#allocation8 + $0x2] sm:$0x3] }
0x10c1   :  { %2754 = vmatpush3.bf16.msra.mxu0 %v3159_v53 }
0x10c2   :  { %2755 = vmatprep.subr.bf16.mxu0 %v3040_v9 }
0x10c3   :  { %v1452_v7 = vld [vmem:[#allocation8] sm:$0x3] }
0x10c4   :  { %v1539_v10 = vrot.slane %v1452_v7, 6 }
0x10c5   :  { %2757 = vmatpush3.bf16.msra.mxu0 %v3164_v58 }
0x10c6   :  { %2758 = vmatprep.subr.bf16.mxu0 %v3040_v9 }
0x10c9   :  { %2760 = vmatpush3.bf16.msra.mxu0 %v3169_v61 }
0x10ca   :  { %2779 = vmatprep.subr.bf16.mxu0 %v3040_v9 }
0x1126   :  { %v1335_v45 = vpop.permute.xlu0 %1334 }
0x1127   :  { %v1337_v46 = vsel %vm154_vm4, %v1323_v40, %v1335_v45 }
0x1128   :  { %2549 = vmatmul.mubr.msk.f32.vlgmr.msra.gmra.mrb[12].mxu1 %vm377_vm6, %v1337_v46 }
0x1129   :  { %2763 = vmatpush3.bf16.msra.mxu1 %v3110_v12  ;;  %2589 = vmatprep.mubr.msk.f32.mxu1 %vm3042_vm5, %v3041_v16 }
0x112a   :  { %2764 = vmatprep.subr.bf16.mxu1 %v3040_v9 }
0x112d   :  { %2766 = vmatpush3.bf16.msra.mxu1 %v3125_v25 }
0x112e   :  { %2767 = vmatprep.subr.bf16.mxu1 %v3040_v9 }
0x118f   :  { %v1522_v47 = vpop.f32.mrb[10].mxu0 }
0x1190   :  { %v1527_v48 = vrot.slane %v1522_v47, 6  ;;  %v2561_v49 = vpop.f32.mrb[11].mxu0 }
0x1192   :  { %v1529_v50 = vadd.f32 %v3142_v31, %v1527_v48 }
0x1194   :  { %v1530_v56 = vadd.f32 %v3147_v32, %v1529_v50 }
0x1196   :  { %v2250_v63 = vmul.f32 -1.442695, %v1530_v56 }
0x11fb   :  { %v1407_v52 = vpop.f32.mrb[12].mxu1 }
0x11fc   :  { %v1408_v54 = vadd.f32 %v3200_v5, %v1407_v52  ;;  %v2550_v55 = vpop.f32.mrb[13].mxu1 }
0x11fe   :  { %2884 = vtanh.f32 %v1408_v54  ;;  %v2248_v62 = vmul.f32 -1.442695, %v1408_v54 }
0x11ff   :  { %2886 = vtanh.f32 %v1530_v56 }
0x1200   :  { %2888 = vpow2.f32 %v2248_v62 }
0x1201   :  { %2890 = vpow2.f32 %v2250_v63 }
0x1208   :  { %v2885_v57 = vpop.eup %2884 }
0x1209   :  { %1424 = vrot.lane.b32.xlu0 %v2885_v57, %s3043_s2  ;;  %v2887_v60 = vpop.eup %2886 }
0x120a   :  { %v2889_v0 = vpop.eup %2888 }
0x120b   :  { %v1414_v1 = vadd.f32 1.0, %v2889_v0  ;;  %v2891_v2 = vpop.eup %2890 }
0x120c   :  { %v1534_v3 = vadd.f32 1.0, %v2891_v2 }
0x120d   :  { %1419 = vrot.lane.b32.xlu0 %v1332_v59, %s3043_s2  ;;  %2892 = vrcp.f32 %v1414_v1 }
0x120e   :  { %2894 = vrcp.f32 %v1534_v3 }
0x1211   :  { %1545 = vrot.lane.b32.xlu0 %v2887_v60, %s3043_s2 }
0x1217   :  { %v2893_v32 = vpop.eup %2892 }
0x1218   :  { %v2895_v11 = vpop.eup %2894 }
0x127b   :  { %v1425_v4 = vpop.permute.xlu0 %1424 }
0x127c   :  { %v1427_v6 = vmul.f32 %v2893_v32, %v1425_v4 }
0x127e   :  { %1429 = vrot.lane.b32.xlu1 %v1427_v6, %s3043_s2 }
0x127f   :  { %v1420_v8 = vpop.permute.xlu0 %1419 }
0x1280   :  { %v1422_v14 = vmul.f32 %v2893_v32, %v1420_v8 }
0x1282   :  { %1540 = vrot.lane.b32.xlu1 %v1539_v10, %s3043_s2 }
0x1283   :  { %v1546_v13 = vpop.permute.xlu0 %1545 }
0x1284   :  { %v1548_v33 = vmul.f32 %v2895_v11, %v1546_v13 }
0x1286   :  { %1550 = vrot.lane.b32.xlu0 %v1548_v33, %s3043_s2 }
0x12f0   :  { %v1430_v15 = vpop.permute.xlu1 %1429 }
0x12f1   :  { %v1432_v17 = vadd.f32 %v1430_v15, %v1422_v14 }
0x12f3   :  { %2896 = vtanh.f32 %v1432_v17 }
0x12f4   :  { %v1541_v18 = vpop.permute.xlu1 %1540 }
0x12f5   :  { %v1543_v19 = vmul.f32 %v2895_v11, %v1541_v18 }
0x12f8   :  { %v1551_v20 = vpop.permute.xlu0 %1550 }
0x12f9   :  { %v1553_v21 = vadd.f32 %v1551_v20, %v1543_v19 }
0x12fb   :  { %2898 = vtanh.f32 %v1553_v21 }
0x12fd   :  { %v2897_v22 = vpop.eup %2896 }
0x12fe   :  { %1435 = vrot.lane.b32.xlu1 %v2897_v22, %s3043_s2 }
0x1305   :  { %v2899_v23 = vpop.eup %2898 }
0x1306   :  { %1556 = vrot.lane.b32.xlu1 %v2899_v23, %s3043_s2 }
0x1370   :  { %v1436_v24 = vpop.permute.xlu1 %1435 }
0x1371   :  { %v1438_v26 = vmul.f32 %v2893_v32, %v1436_v24 }
0x1373   :  { %1440 = vrot.lane.b32.xlu0 %v1438_v26, %s3045_s20 }
0x1378   :  { %v1557_v27 = vpop.permute.xlu1 %1556 }
0x1379   :  { %v1559_v28 = vmul.f32 %v2895_v11, %v1557_v27 }
0x137b   :  { %1561 = vrot.lane.b32.xlu0 %v1559_v28, %s3045_s20 }
0x137f   :  { %1445 = vrot.lane.b32.xlu0 %v1432_v17, %s3044_s19 }
0x1383   :  { %1566 = vrot.lane.b32.xlu0 %v1553_v21, %s3044_s19 }
0x13e5   :  { %v1441_v29 = vpop.permute.xlu0 %1440 }
0x13e6   :  { %1443 = vst.msk [vmem:[#allocation6 + $0x2] sm:$0x3] %vm236_vm3, %v1441_v29  ;;  %1450 = vst.msk [vmem:[#allocation5 + $0x8] sm:$0x3] %vm236_vm3, %v1441_v29 }
0x13ed   :  { %v1562_v30 = vpop.permute.xlu0 %1561  ;;  %v1570_v34 = vld [vmem:[#allocation6 + $0x2] sm:$0x3] }
0x13ee   :  { %1564 = vst.msk [vmem:[#allocation6 - $0x2] sm:$0xc] %vm603_vm7, %v1562_v30  ;;  %v1573_v35 = vrot.slane %v1570_v34, 6 }
0x13f0   :  { %1574 = vrot.lane.b32.xlu1 %v1573_v35, %s3043_s2 }
0x13f1   :  { %v1446_v36 = vpop.permute.xlu0 %1445 }
0x13f2   :  { %1448 = vst.msk [vmem:[#allocation8 + $0x2] sm:$0x3] %vm236_vm3, %v1446_v36 }
0x13f5   :  { %v1567_v37 = vpop.permute.xlu0 %1566  ;;  %v1692_v38 = vld [vmem:[#allocation6] sm:$0x3] }
0x13f6   :  { %1569 = vst.msk [vmem:[#allocation8 - $0x2] sm:$0xc] %vm603_vm7, %v1567_v37  ;;  %2590 = vmatmul.mubr.msk.f32.vlgmr.msra.gmra.mrb[14].mxu1 %vm154_vm4, %v1692_v38 }
0x13f7   :  { %2769 = vmatpush3.bf16.msra.mxu1 %v3156_v51  ;;  %2608 = vmatprep.mubr.msk.f32.mxu1 %vm3042_vm5, %v3041_v16 }
0x13f8   :  { %2770 = vmatprep.subr.bf16.mxu1 %v3040_v9 }
0x13f9   :  { %v1571_v50 = vld [vmem:[#allocation8 + $0x2] sm:$0x3] }
0x13fb   :  { %2772 = vmatpush3.bf16.msra.mxu1 %v3159_v53 }
0x13fc   :  { %2773 = vmatprep.subr.bf16.mxu1 %v3040_v9 }
0x13fd   :  { %v1693_v0 = vld [vmem:[#allocation8] sm:$0x3] }
0x13fe   :  { %v1780_v2 = vrot.slane %v1693_v0, 4 }
0x13ff   :  { %2775 = vmatpush3.bf16.msra.mxu1 %v3164_v58 }
0x1400   :  { %2776 = vmatprep.subr.bf16.mxu1 %v3040_v9 }
0x1403   :  { %2778 = vmatpush3.bf16.msra.mxu1 %v3169_v61 }
0x1462   :  { %v1575_v39 = vpop.permute.xlu1 %1574 }
0x1463   :  { %v1577_v40 = vsel %vm154_vm4, %v1562_v30, %v1575_v39 }
0x1464   :  { %v1579_v41 = vrot.slane %v1577_v40, 2 }
0x1466   :  { %2579 = vmatmul.mubr.msk.f32.vlgmr.msra.gmra.mrb[12].mxu0 %vm377_vm6, %v1579_v41 }
0x1467   :  { %2781 = vmatpush3.bf16.msra.mxu0 %v3110_v12  ;;  %2619 = vmatprep.mubr.msk.f32.mxu0 %vm3042_vm5, %v3041_v16  ;;  %v3406_v12 = vld [vmem:[%s3539_s3] ss:$0 sm:$0xff] }
0x1468   :  { %2782 = vmatprep.subr.bf16.mxu0 %v3040_v9 }
0x146b   :  { %2784 = vmatpush3.bf16.msra.mxu0 %v3125_v25 }
0x146c   :  { %2785 = vmatprep.subr.bf16.mxu0 %v3040_v9 }
0x14c9   :  { %v1763_v42 = vpop.f32.mrb[14].mxu1 }
0x14ca   :  { %v1768_v43 = vrot.slane %v1763_v42, 4  ;;  %v2591_v44 = vpop.f32.mrb[15].mxu1 }
0x14cc   :  { %v1770_v45 = vadd.f32 %v3142_v31, %v1768_v43 }
0x14ce   :  { %v1771_v49 = vadd.f32 %v3406_v12, %v1770_v45 }
0x14d0   :  { %v2254_v54 = vmul.f32 -1.442695, %v1771_v49 }
0x1539   :  { %v1648_v46 = vpop.f32.mrb[12].mxu0 }
0x153a   :  { %v1649_v47 = vadd.f32 %v3200_v5, %v1648_v46  ;;  %v2580_v48 = vpop.f32.mrb[13].mxu0 }
0x153c   :  { %2900 = vtanh.f32 %v1649_v47  ;;  %v2252_v5 = vmul.f32 -1.442695, %v1649_v47 }
0x153d   :  { %2902 = vtanh.f32 %v1771_v49 }
0x153e   :  { %2904 = vpow2.f32 %v2252_v5 }
0x153f   :  { %2906 = vpow2.f32 %v2254_v54 }
0x1546   :  { %v2901_v25 = vpop.eup %2900 }
0x1547   :  { %1665 = vrot.lane.b32.xlu1 %v2901_v25, %s3043_s2  ;;  %v2903_v52 = vpop.eup %2902 }
0x1548   :  { %v2905_v55 = vpop.eup %2904 }
0x1549   :  { %v1655_v56 = vadd.f32 1.0, %v2905_v55  ;;  %v2907_v57 = vpop.eup %2906 }
0x154a   :  { %v1775_v59 = vadd.f32 1.0, %v2907_v57 }
0x154b   :  { %1660 = vrot.lane.b32.xlu1 %v1571_v50, %s3043_s2  ;;  %2908 = vrcp.f32 %v1655_v56 }
0x154c   :  { %2910 = vrcp.f32 %v1775_v59 }
0x154f   :  { %1786 = vrot.lane.b32.xlu1 %v2903_v52, %s3043_s2 }
0x1555   :  { %v2909_v60 = vpop.eup %2908 }
0x1556   :  { %v2911_v3 = vpop.eup %2910 }
0x15b9   :  { %v1666_v62 = vpop.permute.xlu1 %1665 }
0x15ba   :  { %v1668_v63 = vmul.f32 %v2909_v60, %v1666_v62 }
0x15bc   :  { %1670 = vrot.lane.b32.xlu0 %v1668_v63, %s3043_s2 }
0x15bd   :  { %v1661_v1 = vpop.permute.xlu1 %1660 }
0x15be   :  { %v1663_v6 = vmul.f32 %v2909_v60, %v1661_v1 }
0x15c0   :  { %1781 = vrot.lane.b32.xlu0 %v1780_v2, %s3043_s2 }
0x15c1   :  { %v1787_v32 = vpop.permute.xlu1 %1786 }
0x15c2   :  { %v1789_v4 = vmul.f32 %v2911_v3, %v1787_v32 }
0x15c4   :  { %1791 = vrot.lane.b32.xlu1 %v1789_v4, %s3043_s2 }
0x162e   :  { %v1671_v7 = vpop.permute.xlu0 %1670 }
0x162f   :  { %v1673_v8 = vadd.f32 %v1671_v7, %v1663_v6 }
0x1631   :  { %2912 = vtanh.f32 %v1673_v8 }
0x1632   :  { %v1782_v10 = vpop.permute.xlu0 %1781 }
0x1633   :  { %v1784_v11 = vmul.f32 %v2911_v3, %v1782_v10 }
0x1636   :  { %v1792_v13 = vpop.permute.xlu1 %1791 }
0x1637   :  { %v1794_v33 = vadd.f32 %v1792_v13, %v1784_v11 }
0x1639   :  { %2914 = vtanh.f32 %v1794_v33 }
0x163b   :  { %v2913_v14 = vpop.eup %2912 }
0x163c   :  { %1676 = vrot.lane.b32.xlu0 %v2913_v14, %s3043_s2 }
0x1643   :  { %v2915_v15 = vpop.eup %2914 }
0x1644   :  { %1797 = vrot.lane.b32.xlu0 %v2915_v15, %s3043_s2 }
0x16ae   :  { %v1677_v17 = vpop.permute.xlu0 %1676 }
0x16af   :  { %v1679_v18 = vmul.f32 %v2909_v60, %v1677_v17 }
0x16b1   :  { %1681 = vrot.lane.b32.xlu1 %v1679_v18, %s3045_s20 }
0x16b6   :  { %v1798_v19 = vpop.permute.xlu0 %1797 }
0x16b7   :  { %v1800_v20 = vmul.f32 %v2911_v3, %v1798_v19 }
0x16b9   :  { %1802 = vrot.lane.b32.xlu1 %v1800_v20, %s3045_s20 }
0x16bd   :  { %1686 = vrot.lane.b32.xlu1 %v1673_v8, %s3044_s19 }
0x16c1   :  { %1807 = vrot.lane.b32.xlu1 %v1794_v33, %s3044_s19 }
0x1723   :  { %v1682_v21 = vpop.permute.xlu1 %1681 }
0x1724   :  { %1684 = vst.msk [vmem:[#allocation6 + $0x2] sm:$0x3] %vm236_vm3, %v1682_v21  ;;  %1691 = vst.msk [vmem:[#allocation5 + $0xa] sm:$0x3] %vm236_vm3, %v1682_v21 }
0x172b   :  { %v1803_v22 = vpop.permute.xlu1 %1802  ;;  %v1811_v23 = vld [vmem:[#allocation6 + $0x2] sm:$0x3] }
0x172c   :  { %1805 = vst.msk [vmem:[#allocation6 - $0x4] sm:$0x30] %vm845_vm8, %v1803_v22  ;;  %v1814_v24 = vrot.slane %v1811_v23, 4 }
0x172e   :  { %1815 = vrot.lane.b32.xlu0 %v1814_v24, %s3043_s2 }
0x172f   :  { %v1687_v26 = vpop.permute.xlu1 %1686 }
0x1730   :  { %1689 = vst.msk [vmem:[#allocation8 + $0x2] sm:$0x3] %vm236_vm3, %v1687_v26 }
0x1733   :  { %v1808_v27 = vpop.permute.xlu1 %1807  ;;  %v1933_v28 = vld [vmem:[#allocation6] sm:$0x3] }
0x1734   :  { %1810 = vst.msk [vmem:[#allocation8 - $0x4] sm:$0x30] %vm845_vm8, %v1808_v27  ;;  %2620 = vmatmul.mubr.msk.f32.vlgmr.msra.gmra.mrb[14].mxu0 %vm154_vm4, %v1933_v28 }
0x1735   :  { %2787 = vmatpush3.bf16.msra.mxu0 %v3156_v51  ;;  %2638 = vmatprep.mubr.msk.f32.mxu0 %vm3042_vm5, %v3041_v16 }
0x1736   :  { %2788 = vmatprep.subr.bf16.mxu0 %v3040_v9 }
0x1737   :  { %v1812_v39 = vld [vmem:[#allocation8 + $0x2] sm:$0x3] }
0x1739   :  { %2790 = vmatpush3.bf16.msra.mxu0 %v3159_v53 }
0x173a   :  { %2791 = vmatprep.subr.bf16.mxu0 %v3040_v9 }
0x173d   :  { %2793 = vmatpush3.bf16.msra.mxu0 %v3164_v58  ;;  %v3443_v58 = vld [vmem:[%s3539_s3 + $0x1] ss:$0 sm:$0xff]  ;;  %s3046_s3 = smov [#allocation6]  }
0x173e   :  { %2794 = vmatprep.subr.bf16.mxu0 %v3040_v9  ;;  %s2191_s27 = sshll.u32 %s3046_s3, 4  ;;  %s2192_s27 = int_to_ptr.vmem [resolvable:$true] %s2191_s27 }
0x173f   :  { %s2964_s8 = scalar_lea.vmem %s2192_s27, 64  ;;  %p2969_p9 = scmp.lt.s32.totalorder %s2192_s27, %s2192_s27 }
0x1740   :  { %p2965_p8 = scmp.ne.s32.totalorder %s2192_s27, %s2964_s8  ;;  %p2970_p10 = scmp.lt.s32.totalorder %s2964_s8, %s2964_s8 }
0x1741   :  { %2796 = vmatpush3.bf16.msra.mxu0 %v3169_v61 }
0x1742   :  { %p2971_p11 = por %p2970_p10, %p2969_p9 }
0x1744   :  { %p2972_p12 = pnand %p2971_p11, %p2965_p8 }
0x17a0   :  { %v1816_v29 = vpop.permute.xlu0 %1815 }
0x17a1   :  { %v1818_v30 = vsel %vm154_vm4, %v1803_v22, %v1816_v29 }
0x17a2   :  { %v1820_v34 = vrot.slane %v1818_v30, 4 }
0x17a4   :  { %2609 = vmatmul.mubr.msk.f32.vlgmr.msra.gmra.mrb[16].mxu1 %vm377_vm6, %v1820_v34 }
0x1807   :  { %v2004_v51 = vpop.f32.mrb[14].mxu0 }
0x1808   :  { %v2009_v16 = vrot.slane %v2004_v51, 2  ;;  %v2621_v35 = vpop.f32.mrb[15].mxu0 }
0x180a   :  { %v2011_v36 = vadd.f32 %v3142_v31, %v2009_v16 }
0x180c   :  { %v2012_v37 = vadd.f32 %v3406_v12, %v2011_v36  ;;  %v1934_v12 = vld [vmem:[#allocation8] sm:$0x3] }
0x180d   :  { %v2021_v25 = vrot.slane %v1934_v12, 2 }
0x180e   :  { %v2258_v41 = vmul.f32 -1.442695, %v2012_v37 }
0x1877   :  { %v1889_v53 = vpop.f32.mrb[16].mxu1 }
0x1878   :  { %v1890_v9 = vadd.f32 %v3443_v58, %v1889_v53  ;;  %v2610_v61 = vpop.f32.mrb[17].mxu1 }
0x187a   :  { %2916 = vtanh.f32 %v1890_v9  ;;  %v2256_v40 = vmul.f32 -1.442695, %v1890_v9 }
0x187b   :  { %2918 = vtanh.f32 %v2012_v37 }
0x187c   :  { %2920 = vpow2.f32 %v2256_v40 }
0x187d   :  { %2922 = vpow2.f32 %v2258_v41 }
0x1884   :  { %v2917_v38 = vpop.eup %2916 }
0x1885   :  { %1906 = vrot.lane.b32.xlu0 %v2917_v38, %s3043_s2  ;;  %v2919_v31 = vpop.eup %2918 }
0x1886   :  { %v2921_v42 = vpop.eup %2920 }
0x1887   :  { %v1896_v43 = vadd.f32 1.0, %v2921_v42  ;;  %v2923_v44 = vpop.eup %2922 }
0x1888   :  { %v2016_v45 = vadd.f32 1.0, %v2923_v44 }
0x1889   :  { %1901 = vrot.lane.b32.xlu0 %v1812_v39, %s3043_s2  ;;  %2924 = vrcp.f32 %v1896_v43 }
0x188a   :  { %2926 = vrcp.f32 %v2016_v45 }
0x188d   :  { %2027 = vrot.lane.b32.xlu0 %v2919_v31, %s3043_s2 }
0x1893   :  { %v2925_v46 = vpop.eup %2924 }
0x1894   :  { %v2927_v50 = vpop.eup %2926 }
0x18f7   :  { %v1907_v47 = vpop.permute.xlu0 %1906 }
0x18f8   :  { %v1909_v48 = vmul.f32 %v2925_v46, %v1907_v47 }
0x18fa   :  { %1911 = vrot.lane.b32.xlu1 %v1909_v48, %s3043_s2 }
0x18fb   :  { %v1902_v49 = vpop.permute.xlu0 %1901 }
0x18fc   :  { %v1904_v54 = vmul.f32 %v2925_v46, %v1902_v49 }
0x18fe   :  { %2022 = vrot.lane.b32.xlu1 %v2021_v25, %s3043_s2 }
0x18ff   :  { %v2028_v52 = vpop.permute.xlu0 %2027 }
0x1900   :  { %v2030_v5 = vmul.f32 %v2927_v50, %v2028_v52 }
0x1902   :  { %2032 = vrot.lane.b32.xlu0 %v2030_v5, %s3043_s2 }
0x196c   :  { %v1912_v55 = vpop.permute.xlu1 %1911 }
0x196d   :  { %v1914_v56 = vadd.f32 %v1912_v55, %v1904_v54 }
0x196f   :  { %2928 = vtanh.f32 %v1914_v56 }
0x1970   :  { %v2023_v57 = vpop.permute.xlu1 %2022 }
0x1971   :  { %v2025_v59 = vmul.f32 %v2927_v50, %v2023_v57 }
0x1974   :  { %v2033_v60 = vpop.permute.xlu0 %2032 }
0x1975   :  { %v2035_v62 = vadd.f32 %v2033_v60, %v2025_v59 }
0x1977   :  { %2930 = vtanh.f32 %v2035_v62 }
0x1979   :  { %v2929_v63 = vpop.eup %2928 }
0x197a   :  { %1917 = vrot.lane.b32.xlu1 %v2929_v63, %s3043_s2 }
0x1981   :  { %v2931_v0 = vpop.eup %2930 }
0x1982   :  { %2038 = vrot.lane.b32.xlu1 %v2931_v0, %s3043_s2 }
0x19ec   :  { %v1918_v1 = vpop.permute.xlu1 %1917 }
0x19ed   :  { %v1920_v2 = vmul.f32 %v2925_v46, %v1918_v1 }
0x19ef   :  { %1922 = vrot.lane.b32.xlu0 %v1920_v2, %s3045_s20 }
0x19f4   :  { %v2039_v3 = vpop.permute.xlu1 %2038 }
0x19f5   :  { %v2041_v32 = vmul.f32 %v2927_v50, %v2039_v3 }
0x19f7   :  { %2043 = vrot.lane.b32.xlu0 %v2041_v32, %s3045_s20 }
0x19fb   :  { %1927 = vrot.lane.b32.xlu0 %v1914_v56, %s3044_s19 }
0x1a61   :  { %v1923_v4 = vpop.permute.xlu0 %1922 }
0x1a62   :  { %1925 = vst.msk [vmem:[#allocation6 + $0x2] sm:$0x3] %vm236_vm3, %v1923_v4  ;;  %1932 = vst.msk [vmem:[#allocation5 + $0xc] sm:$0x3] %vm236_vm3, %v1923_v4 }
0x1a69   :  { %v2044_v6 = vpop.permute.xlu0 %2043  ;;  %v2052_v7 = vld [vmem:[#allocation6 + $0x2] sm:$0x3] }
0x1a6a   :  { %2046 = vst.msk [vmem:[#allocation6 - $0x6] sm:$0xc0] %vm1087_vm9, %v2044_v6  ;;  %v2055_v8 = vrot.slane %v2052_v7, 2 }
0x1a6c   :  { %2056 = vrot.lane.b32.xlu1 %v2055_v8, %s3043_s2 }
0x1a6d   :  { %v1928_v10 = vpop.permute.xlu0 %1927 }
0x1a6e   :  { %1930 = vst.msk [vmem:[#allocation8 + $0x2] sm:$0x3] %vm236_vm3, %v1928_v10 }
0x1a75   :  { %v2053_v11 = vld [vmem:[#allocation8 + $0x2] sm:$0x3] }
0x1a76   :  { %2142 = vrot.lane.b32.xlu0 %v2053_v11, %s3043_s2 }
0x1ade   :  { %v2057_v13 = vpop.permute.xlu1 %2056 }
0x1adf   :  { %v2059_v33 = vsel %vm154_vm4, %v2044_v6, %v2057_v13 }
0x1ae0   :  { %v2061_v14 = vrot.slane %v2059_v33, 6 }
0x1ae2   :  { %2639 = vmatmul.mubr.msk.f32.vlgmr.msra.gmra.mrb[16].mxu0 %vm377_vm6, %v2061_v14 }
0x1ae8   :  { %v2143_v27 = vpop.permute.xlu0 %2142 }
0x1bb5   :  { %v2130_v15 = vpop.f32.mrb[16].mxu0 }
0x1bb6   :  { %v2131_v17 = vadd.f32 %v3443_v58, %v2130_v15  ;;  %v2640_v18 = vpop.f32.mrb[17].mxu0 }
0x1bb8   :  { %2932 = vtanh.f32 %v2131_v17  ;;  %v2260_v20 = vmul.f32 -1.442695, %v2131_v17 }
0x1bba   :  { %2934 = vpow2.f32 %v2260_v20 }
0x1bc2   :  { %v2933_v19 = vpop.eup %2932 }
0x1bc3   :  { %2147 = vrot.lane.b32.xlu1 %v2933_v19, %s3043_s2 }
0x1bc4   :  { %v2935_v21 = vpop.eup %2934 }
0x1bc5   :  { %v2137_v22 = vadd.f32 1.0, %v2935_v21 }
0x1bc7   :  { %2936 = vrcp.f32 %v2137_v22 }
0x1bd1   :  { %v2937_v23 = vpop.eup %2936 }
0x1bd2   :  { %v2145_v28 = vmul.f32 %v2937_v23, %v2143_v27 }
0x1c35   :  { %v2148_v24 = vpop.permute.xlu1 %2147 }
0x1c36   :  { %v2150_v26 = vmul.f32 %v2937_v23, %v2148_v24 }
0x1c38   :  { %2152 = vrot.lane.b32.xlu1 %v2150_v26, %s3043_s2 }
0x1caa   :  { %v2153_v29 = vpop.permute.xlu1 %2152 }
0x1cab   :  { %v2155_v30 = vadd.f32 %v2153_v29, %v2145_v28 }
0x1cad   :  { %2938 = vtanh.f32 %v2155_v30 }
0x1cb7   :  { %v2939_v34 = vpop.eup %2938 }
0x1cb8   :  { %2158 = vrot.lane.b32.xlu0 %v2939_v34, %s3043_s2 }
0x1cbc   :  { %2048 = vrot.lane.b32.xlu0 %v2035_v62, %s3044_s19 }
0x1d2a   :  { %v2159_v51 = vpop.permute.xlu0 %2158 }
0x1d2b   :  { %v2161_v16 = vmul.f32 %v2937_v23, %v2159_v51 }
0x1d2d   :  { %2163 = vrot.lane.b32.xlu1 %v2161_v16, %s3045_s20 }
0x1d2e   :  { %v2049_v35 = vpop.permute.xlu0 %2048 }
0x1d2f   :  { %2051 = vst.msk [vmem:[#allocation8 - $0x6] sm:$0xc0] %vm1087_vm9, %v2049_v35 }
0x1d31   :  { %2168 = vrot.lane.b32.xlu1 %v2155_v30, %s3044_s19 }
0x1d9f   :  { %v2164_v36 = vpop.permute.xlu1 %2163 }
0x1da0   :  { %2173 = vst.msk [vmem:[#allocation5 + $0xe] sm:$0x3] %vm236_vm3, %v2164_v36  ;;  %2166 = vst.msk [vmem:[#allocation6 + $0x2] sm:$0x3] %vm236_vm3, %v2164_v36 }
0x1da1   :  { %2975 = shalt.err (!%p2972_p12)
}
0x1da2   :  { %s2976_s11 = scalar_lea.hbm %s3541_s5, 64 }
0x1da3   :  { %p2977_p13 = scmp.ne.s32.totalorder %s3541_s5, %s2976_s11  ;;  %p2980_p0 = scmp.lt.u32.totalorder %s2976_s11, %s3541_s5 }
0x1da5   :  { %p2982_p1 = pnand %p2980_p0, %p2977_p13 }
0x1da7   :  { %2985 = shalt.err (!%p2982_p1)
}
0x1da8   :  { %s3049_s16 = smov 2   ;;  %s2986_s0 = scalar_lea.vmem %s3474_s29, 256 }
0x1da9   :  { %2197 = dma.vmem_to_hbm [thread:$0]  %s2192_s27, 64, %s3541_s5, [#allocation7], %s3043_s2, %s3043_s2, %s3049_s16  }
0x1daa   :  { %p2987_p2 = scmp.ne.s32.totalorder %s3474_s29, %s2986_s0  ;;  %p2991_p3 = scmp.lt.s32.totalorder %s3474_s29, %s3474_s29 }
0x1dab   :  { %p2992_p4 = scmp.lt.s32.totalorder %s2986_s0, %s2986_s0 }
0x1dad   :  { %p2993_p5 = por %p2992_p4, %p2991_p3 }
0x1daf   :  { %p2994_p6 = pnand %p2993_p5, %p2987_p2 }
0x1db1   :  { %2997 = shalt.err (!%p2994_p6)
}
0x1db2   :  { %s2998_s20 = scalar_lea.hbm %s3540_s4, 256 }
0x1db3   :  { %p2999_p7 = scmp.ne.s32.totalorder %s3540_s4, %s2998_s20  ;;  %p3002_p8 = scmp.lt.u32.totalorder %s2998_s20, %s3540_s4 }
0x1db5   :  { %p3004_p9 = pnand %p3002_p8, %p2999_p7 }
0x1db7   :  { %3007 = shalt.err (!%p3004_p9)
}
0x1db8   :  { %2185 = dma.vmem_to_hbm [thread:$0]  %s3474_s29, 256, %s3540_s4, [#allocation4], %s3043_s2, %s3043_s2, %s3049_s16   ;;  %v2169_v53 = vpop.permute.xlu1 %2168 }
0x1db9   :  { %2171 = vst.msk [vmem:[#allocation8 + $0x2] sm:$0x3] %vm236_vm3, %v2169_v53  ;;  %s3008_s26 = scalar_lea.vmem %s3478_s7, 64  ;;  %p3013_p11 = scmp.lt.s32.totalorder %s3478_s7, %s3478_s7 }
0x1dba   :  { %p3009_p10 = scmp.ne.s32.totalorder %s3478_s7, %s3008_s26  ;;  %p3014_p12 = scmp.lt.s32.totalorder %s3008_s26, %s3008_s26 }
0x1dbc   :  { %p3015_p13 = por %p3014_p12, %p3013_p11 }
0x1dbe   :  { %p3016_p0 = pnand %p3015_p13, %p3009_p10 }
0x1dc0   :  { %3019 = shalt.err (!%p3016_p0)
}
0x1dc1   :  { %s3020_s28 = scalar_lea.hbm %s3542_s6, 64 }
0x1dc2   :  { %p3021_p1 = scmp.ne.s32.totalorder %s3542_s6, %s3020_s28  ;;  %p3024_p2 = scmp.lt.u32.totalorder %s3020_s28, %s3542_s6 }
0x1dc4   :  { %p3026_p3 = pnand %p3024_p2, %p3021_p1 }
0x1dc6   :  { %3029 = shalt.err (!%p3026_p3)
}
0x1dc7   :  { %2209 = dma.vmem_to_hbm [thread:$0]  %s3478_s7, 64, %s3542_s6, [#allocation7], %s3043_s2, %s3043_s2, %s3049_s16  }
0x1dc8   :  { %3032 = dma.done.wait [#allocation4], 256  }
0x1dc9   :  { %3033 = vsyncadd [#allocation4], 4294967040 }
0x1dca   :  { %3034 = dma.done.wait [#allocation7], 128  }
0x1dcb   :  { %3035 = vsyncadd [#allocation7], 4294967168 }
0x1dcc   :  { %2219 = vsyncpa [#allocation3], 1 }
0x1dcd   :  { %2220 = vsyncpa [#allocation4], 1 }
0x1dce   :  { %2221 = vsyncpa [#allocation7], 1 }

</bundles_post_ra>
